<compile_context>
chip_gen: v6e
topology: v6e:2x2x1
jax: 0.10.0
libtpu: 0.0.40
codegen_flags: <defaults>
</compile_context>

<pallas_src>
import functools

import jax
import jax.numpy as jnp
from jax import lax
from jax.experimental import pallas as pl
from jax.experimental.pallas import tpu as pltpu

# ----------------------------- configuration ------------------------------ #
OUTPUT_DIM = 768             # per-token output dim (module default)
TOKEN_NUM = 1                # kernel supports token_num == 1 (module default)
NUM_PE_TIME_ANCHORS = 200    # == input_dim when use_positional_encoding=True
IN_PAD = 256                 # 200 padded up to a lane-friendly 256
NUM_W = 128                  # encoder fourier feature width (encoder.num_w)
HALF_W = NUM_W // 2
SIGMA_T = 1.0
IMG_DIM = 512                # image_embedding feature dim
HID = 128
LN_EPS = 1e-5
LEAKY_SLOPE = 0.01
L2_EPS = 1e-12               # F.normalize default eps
MAX_ROWS_PER_BLOCK = 256     # batch tile; grid over batch above this

# --------------------- packed parameter blob layouts ----------------------- #
# blob "w128"  : bf16 (128, 640)  -- all K=128 weights packed along lanes.
W128_OFF = {"w_in": 0, "tp_w2": IN_PAD, "ip_w1e": IN_PAD + HID,
            "ip_w2": IN_PAD + 2 * HID}
W128_COLS = IN_PAD + 3 * HID                       # 640

# blob "wtall" : bf16 (768, 128)  -- K=256 / K=512 weights packed along rows.
WTALL_ROWS = IN_PAD + IMG_DIM                      # 768

# blob "heads" : bf16 (128, 1536) -- the two (128, 768) output heads.
HEADS_COLS = 2 * OUTPUT_DIM

# blob "vec"   : f32 (1, 4352) -- freqs/phase + every bias/gamma/beta + scale.
_VEC_LAYOUT = (
    ("wenc", NUM_W), ("phase", NUM_W), ("b_in", IN_PAD),
    ("tp_b1", HID), ("tp_g1", HID), ("tp_be1", HID),
    ("tp_b2", HID), ("tp_g2", HID), ("tp_be2", HID),
    ("ip_b1", HID), ("ip_g1", HID), ("ip_be1", HID),
    ("ip_b2", HID), ("ip_g2", HID), ("ip_be2", HID),
    ("iout_b", OUTPUT_DIM), ("out_b", OUTPUT_DIM), ("ns", OUTPUT_DIM),
)
VEC_OFF = {}
_off = 0
for _name, _n in _VEC_LAYOUT:
    VEC_OFF[_name] = _off
    _off += _n
VEC_COLS = _off                                    # 4352; every offset % 128 == 0


# ------------------------------- the kernel ------------------------------- #
def mapper_kernel(t_ref, img_ref, word_ref, w128_ref, wtall_ref, vec_ref,
                  heads_ref, o_ref, *scratch, manual_heads):
    f32, bf16 = jnp.float32, jnp.bfloat16

    # Overlap the ~384 KB head-weight DMA with the entire prologue.
    if manual_heads:
        heads_vmem, heads_sem = scratch
        head_cp = pltpu.make_async_copy(heads_ref, heads_vmem, heads_sem)
        head_cp.start()

    def vec(name, n):
        o = VEC_OFF[name]
        return vec_ref[:, o:o + n]                    # (1, n) f32, lane-aligned

    def w128(name, n):
        o = W128_OFF[name]
        return w128_ref[:, o:o + n]                   # (128, n) bf16

    def mm(x16, w16):
        return jnp.dot(x16, w16, preferred_element_type=f32)

    def layernorm(x, g, b):
        mu = jnp.mean(x, axis=-1, keepdims=True)
        d = x - mu
        var = jnp.mean(d * d, axis=-1, keepdims=True)
        return d * lax.rsqrt(var + LN_EPS) * vec(g, HID) + vec(b, HID)

    def leaky(x):
        return jnp.maximum(x, LEAKY_SLOPE * x)

    # --- fourier time encoding: sin(t*w + phase) == [sin(tw) | cos(tw)] ------
    proj = t_ref[...] * vec("wenc", NUM_W) + vec("phase", NUM_W)     # (TB, 128)
    feats = jnp.sin(proj).astype(bf16)

    # --- input_layer: single K=128 MXU pass, output zero-padded 200 -> 256 ---
    t_emb = mm(feats, w128("w_in", IN_PAD)) + vec("b_in", IN_PAD)    # (TB, 256)

    # --- timestep_proj: (Linear -> LN -> LeakyReLU) x 2 ----------------------
    h = mm(t_emb.astype(bf16), wtall_ref[0:IN_PAD, :]) + vec("tp_b1", HID)
    h = leaky(layernorm(h, "tp_g1", "tp_be1"))
    emb = mm(h.astype(bf16), w128("tp_w2", HID)) + vec("tp_b2", HID)
    emb = leaky(layernorm(emb, "tp_g2", "tp_be2"))                   # (TB, 128)
    emb16 = emb.astype(bf16)      # cast once; reused by image_proj & output head

    # --- image_proj: 640-wide input concat realized as a split matmul --------
    byp = (mm(emb16, w128("ip_w1e", HID))
           + mm(img_ref[...].astype(bf16), wtall_ref[IN_PAD:WTALL_ROWS, :])
           + vec("ip_b1", HID))
    byp = leaky(layernorm(byp, "ip_g1", "ip_be1"))
    byp = mm(byp.astype(bf16), w128("ip_w2", HID)) + vec("ip_b2", HID)
    byp = leaky(layernorm(byp, "ip_g2", "ip_be2"))
    byp16 = byp.astype(bf16)

    # --- head weights: wait as late as possible (hidden behind the prologue) -
    if manual_heads:
        head_cp.wait()
        heads = heads_vmem
    else:
        heads = heads_ref

    # --- bypass head; store immediately to bound its live range --------------
    o_ref[:, OUTPUT_DIM:] = (mm(byp16, heads[:, 0:OUTPUT_DIM])
                             + vec("iout_b", OUTPUT_DIM))
    # TODO(synk): training-time random bypass zeroing (random.random() < 0.5)
    # is eval-irrelevant and intentionally omitted (inference semantics).

    # --- main head + residual, L2-normalize, scale ----------------------------
    e = (mm(emb16, heads[:, OUTPUT_DIM:HEADS_COLS])
         + vec("out_b", OUTPUT_DIM) + word_ref[...])
    sumsq = jnp.sum(e * e, axis=-1, keepdims=True)
    inv = lax.rsqrt(jnp.maximum(sumsq, L2_EPS * L2_EPS))   # 1 / max(||e||, eps)
    o_ref[:, 0:OUTPUT_DIM] = e * inv * vec("ns", OUTPUT_DIM)


# ----------------------------- encoder (glue) ------------------------------ #
def encode_time(t, w):
    """TimePositionalEncoding.encode: [sin(t*w) | cos(t*w)]."""
    proj = t[:, None] * w[None, :]
    return jnp.concatenate([jnp.sin(proj), jnp.cos(proj)], axis=-1)


def encoder_init_layer(w):
    """encoder.init_layer(num_time_anchors): encode anchor timesteps 0..1000."""
    step = 1000 // NUM_PE_TIME_ANCHORS
    anchors = jnp.arange(0, 1000, step, dtype=jnp.float32)   # (200,)
    return encode_time(anchors, w)                           # (200, 128)


# ------------------------------ param setup -------------------------------- #
def make_params(key, norm_scale=0.27):
    ks = jax.random.split(key, 8)
    f32 = jnp.float32

    def lin_w(k, fan_in, fan_out, scale=0.02):
        return jax.random.normal(k, (fan_in, fan_out), f32) * scale

    enc_w = jax.random.normal(ks[0], (HALF_W,), f32) * SIGMA_T

    # input_layer: Linear(num_w=128, 200) with weight := encoder.init_layer(200).
    # Stored transposed (128, 200); output dim zero-padded 200 -> 256 (inert).
    w_in = encoder_init_layer(enc_w).T                               # (128, 200)
    w_in = jnp.pad(w_in, ((0, 0), (0, IN_PAD - NUM_PE_TIME_ANCHORS)))

    # timestep_proj Linear(200, 128): input rows zero-padded 200 -> 256 (inert).
    tp_w1 = jnp.pad(lin_w(ks[1], NUM_PE_TIME_ANCHORS, HID),
                    ((0, IN_PAD - NUM_PE_TIME_ANCHORS), (0, 0)))
    tp_w2 = lin_w(ks[2], HID, HID)

    # image_proj Linear(640, 128) pre-split: rows acting on the timestep emb
    # vs. rows acting on the image embedding.
    ip_w1e = lin_w(ks[3], HID, HID)
    ip_w1i = lin_w(ks[4], IMG_DIM, HID)
    ip_w2 = lin_w(ks[5], HID, HID)

    iout_w = lin_w(ks[6], HID, TOKEN_NUM * OUTPUT_DIM)
    out_w = lin_w(ks[7], HID, TOKEN_NUM * OUTPUT_DIM)

    zeros_h, ones_h = jnp.zeros((HID,), f32), jnp.ones((HID,), f32)

    # ---- packed bf16 weight blobs ----
    w128 = jnp.concatenate([w_in, tp_w2, ip_w1e, ip_w2], axis=1).astype(jnp.bfloat16)
    wtall = jnp.concatenate([tp_w1, ip_w1i], axis=0).astype(jnp.bfloat16)
    heads = jnp.concatenate([iout_w, out_w], axis=1).astype(jnp.bfloat16)

    # ---- packed f32 vector blob ----
    pieces = {
        "wenc": jnp.concatenate([enc_w, enc_w]),
        "phase": jnp.concatenate([jnp.zeros((HALF_W,), f32),
                                  jnp.full((HALF_W,), jnp.pi / 2, f32)]),
        "b_in": jnp.zeros((IN_PAD,), f32),
        "tp_b1": zeros_h, "tp_g1": ones_h, "tp_be1": zeros_h,
        "tp_b2": zeros_h, "tp_g2": ones_h, "tp_be2": zeros_h,
        "ip_b1": zeros_h, "ip_g1": ones_h, "ip_be1": zeros_h,
        "ip_b2": zeros_h, "ip_g2": ones_h, "ip_be2": zeros_h,
        "iout_b": jnp.zeros((OUTPUT_DIM,), f32),
        "out_b": jnp.zeros((OUTPUT_DIM,), f32),
        "ns": jnp.full((OUTPUT_DIM,), norm_scale, f32),
    }
    vec = jnp.concatenate([pieces[name] for name, _ in _VEC_LAYOUT])[None, :]
    assert vec.shape == (1, VEC_COLS)
    assert w128.shape == (HID, W128_COLS)
    assert wtall.shape == (WTALL_ROWS, HID)
    assert heads.shape == (HID, HEADS_COLS)

    return dict(w128=w128, wtall=wtall, heads=heads, vec=vec)


# ------------------------------- wrapper ----------------------------------- #
@jax.jit
def mapper_forward(timesteps, word_embedding, image_embedding, params):
    B = timesteps.shape[0]
    t = timesteps.astype(jnp.float32).reshape(B, 1)
    w128, wtall = params["w128"], params["wtall"]
    heads, vec = params["heads"], params["vec"]

    TB = min(B, MAX_ROWS_PER_BLOCK)
    grid = (pl.cdiv(B, TB),)
    manual_heads = grid[0] == 1      # single tile: overlap head DMA with prologue

    row = lambda i: (i, 0)
    const = lambda i: (0, 0)
    in_specs = [
        pl.BlockSpec((TB, 1), row),                 # t
        pl.BlockSpec((TB, IMG_DIM), row),           # image_embedding
        pl.BlockSpec((TB, OUTPUT_DIM), row),        # word_embedding
        pl.BlockSpec((HID, W128_COLS), const),      # packed K=128 weights
        pl.BlockSpec((WTALL_ROWS, HID), const),     # packed tall weights
        pl.BlockSpec((1, VEC_COLS), const),         # packed biases/LN/freqs/scale
    ]
    if manual_heads:
        in_specs.append(pl.BlockSpec(memory_space=pl.ANY))   # heads stay in HBM
        scratch_shapes = [pltpu.VMEM((HID, HEADS_COLS), jnp.bfloat16),
                          pltpu.SemaphoreType.DMA]
    else:
        in_specs.append(pl.BlockSpec((HID, HEADS_COLS), const))
        scratch_shapes = []

    out_shape = jax.ShapeDtypeStruct((B * TOKEN_NUM, 2 * OUTPUT_DIM), jnp.float32)
    out_specs = pl.BlockSpec((TB, 2 * OUTPUT_DIM), row)

    args = (t, image_embedding, word_embedding, w128, wtall, vec, heads)

    # Advisory cost estimate so XLA can schedule around this tiny custom call.
    mm_flops = 2 * B * (
        NUM_W * IN_PAD            # input_layer (single K=128 pass)
        + IN_PAD * HID            # timestep_proj linear 1
        + HID * HID               # timestep_proj linear 2
        + (HID + IMG_DIM) * HID   # image_proj linear 1 (split)
        + HID * HID               # image_proj linear 2
        + 2 * HID * OUTPUT_DIM)   # two output heads
    cost = pl.CostEstimate(
        flops=int(mm_flops),
        transcendentals=int(B * (NUM_W + 5)),   # sin + LN/normalize rsqrts
        bytes_accessed=int(sum(x.size * x.dtype.itemsize for x in args)
                           + B * TOKEN_NUM * 2 * OUTPUT_DIM * 4),
    )

    return pl.pallas_call(
        functools.partial(mapper_kernel, manual_heads=manual_heads),
        grid=grid,
        in_specs=in_specs,
        out_specs=out_specs,
        out_shape=out_shape,
        scratch_shapes=scratch_shapes,
        compiler_params=pltpu.CompilerParams(dimension_semantics=("parallel",)),
        cost_estimate=cost,
    )(*args)


# --------------------------- pure-JAX reference ----------------------------- #
def mapper_reference(timesteps, word_embedding, image_embedding, params):
    """Reference forward using the same packed (bf16-quantized) weights."""
    f32 = jnp.float32
    w128 = params["w128"].astype(f32)
    wtall = params["wtall"].astype(f32)
    heads = params["heads"].astype(f32)
    vec = params["vec"][0]

    def v(name, n):
        o = VEC_OFF[name]
        return vec[o:o + n]

    w_in = w128[:, W128_OFF["w_in"]:W128_OFF["w_in"] + IN_PAD]
    tp_w2 = w128[:, W128_OFF["tp_w2"]:W128_OFF["tp_w2"] + HID]
    ip_w1e = w128[:, W128_OFF["ip_w1e"]:W128_OFF["ip_w1e"] + HID]
    ip_w2 = w128[:, W128_OFF["ip_w2"]:W128_OFF["ip_w2"] + HID]
    tp_w1 = wtall[:IN_PAD]
    ip_w1i = wtall[IN_PAD:]
    iout_w = heads[:, :OUTPUT_DIM]
    out_w = heads[:, OUTPUT_DIM:]

    def ln(x, g, b):
        mu = x.mean(-1, keepdims=True)
        var = ((x - mu) ** 2).mean(-1, keepdims=True)
        return (x - mu) / jnp.sqrt(var + LN_EPS) * g + b

    def lrelu(x):
        return jnp.where(x >= 0, x, LEAKY_SLOPE * x)

    t = timesteps.astype(f32)[:, None]
    w = v("wenc", HALF_W)
    feats = jnp.concatenate([jnp.sin(t * w), jnp.cos(t * w)], axis=-1)
    t_emb = feats @ w_in + v("b_in", IN_PAD)

    h = lrelu(ln(t_emb @ tp_w1 + v("tp_b1", HID), v("tp_g1", HID), v("tp_be1", HID)))
    emb = lrelu(ln(h @ tp_w2 + v("tp_b2", HID), v("tp_g2", HID), v("tp_be2", HID)))

    byp = (jnp.concatenate([emb, image_embedding.astype(f32)], axis=-1)
           @ jnp.concatenate([ip_w1e, ip_w1i], axis=0) + v("ip_b1", HID))
    byp = lrelu(ln(byp, v("ip_g1", HID), v("ip_be1", HID)))
    byp = lrelu(ln(byp @ ip_w2 + v("ip_b2", HID), v("ip_g2", HID), v("ip_be2", HID)))
    byp = byp @ iout_w + v("iout_b", OUTPUT_DIM)

    e = emb @ out_w + v("out_b", OUTPUT_DIM) + word_embedding.astype(f32)
    nrm = jnp.maximum(jnp.linalg.norm(e, axis=-1, keepdims=True), L2_EPS)
    e = e / nrm * v("ns", OUTPUT_DIM)
    return jnp.concatenate([e, byp], axis=-1)


# --------------------------------- main ------------------------------------ #
if __name__ == "__main__":
    key = jax.random.PRNGKey(0)
    k_p, k_t, k_w, k_i = jax.random.split(key, 4)

    B = 2
    params = make_params(k_p)
    timesteps = jax.random.randint(k_t, (B,), 0, 1000).astype(jnp.float32)
    word_embedding = jax.random.normal(k_w, (B * TOKEN_NUM, OUTPUT_DIM), jnp.float32)
    image_embedding = jax.random.normal(k_i, (B, IMG_DIM), jnp.float32)

    out = mapper_forward(timesteps, word_embedding, image_embedding, params)
    out = jax.block_until_ready(out)

    assert out.shape == (B * TOKEN_NUM, 2 * OUTPUT_DIM), out.shape
    assert bool(jnp.all(jnp.isfinite(out)))

    # Correctness vs. a pure-JAX reference using the identical packed weights;
    # loose tolerance covers the kernel's bf16 activation casts on the MXU path.
    ref = mapper_reference(timesteps, word_embedding, image_embedding, params)
    assert bool(jnp.allclose(out, ref, rtol=5e-2, atol=5e-2)), float(
        jnp.max(jnp.abs(out - ref)))

    print("KERNEL_OK")
</pallas_src>

<mosaic_0001>
module attributes {stable_mosaic.version = 11 : i64} {
  func.func @mapper_kernel(%arg0: i32, %arg1: memref<2x1xf32, #tpu.memory_space<vmem>>, %arg2: memref<2x512xf32, #tpu.memory_space<vmem>>, %arg3: memref<2x768xf32, #tpu.memory_space<vmem>>, %arg4: memref<128x640xbf16, #tpu.memory_space<vmem>>, %arg5: memref<768x128xbf16, #tpu.memory_space<vmem>>, %arg6: memref<1x4352xf32, #tpu.memory_space<vmem>>, %arg7: memref<128x1536xbf16, #tpu.memory_space<any>>, %arg8: memref<2x1536xf32, #tpu.memory_space<vmem>>, %arg9: memref<128x1536xbf16, #tpu.memory_space<vmem>>, %arg10: memref<!tpu.dma_semaphore, #tpu.memory_space<semaphore_mem>>) attributes {dimension_semantics = [#tpu.dimension_semantics<parallel>], iteration_bounds = array<i64: 1>, scalar_prefetch = 0 : i64, scratch_operands = 2 : i64, tpu.core_type = #tpu.core_type<tc>, window_params = [{transform_indices = @transform_0, window_bounds = array<i64: 2, 1>}, {transform_indices = @transform_1, window_bounds = array<i64: 2, 512>}, {transform_indices = @transform_2, window_bounds = array<i64: 2, 768>}, {pipeline_mode = #tpu.pipeline_mode<synchronous>, transform_indices = @transform_3, window_bounds = array<i64: 128, 640>}, {pipeline_mode = #tpu.pipeline_mode<synchronous>, transform_indices = @transform_4, window_bounds = array<i64: 768, 128>}, {pipeline_mode = #tpu.pipeline_mode<synchronous>, transform_indices = @transform_5, window_bounds = array<i64: 1, 4352>}, {}, {transform_indices = @transform_7, window_bounds = array<i64: 2, 1536>}]} {
    tpu.enqueue_dma source(%arg7 : memref<128x1536xbf16, #tpu.memory_space<any>>) target(%arg9 : memref<128x1536xbf16, #tpu.memory_space<vmem>>) target_semaphore(%arg10 : memref<!tpu.dma_semaphore, #tpu.memory_space<semaphore_mem>>)
    %c0 = arith.constant 0 : index
    %c0_0 = arith.constant 0 : index
    %0 = vector.load %arg1[%c0, %c0_0] : memref<2x1xf32, #tpu.memory_space<vmem>>, vector<2x1xf32>
    %c0_1 = arith.constant 0 : index
    %c0_2 = arith.constant 0 : index
    %1 = vector.load %arg6[%c0_1, %c0_2] : memref<1x4352xf32, #tpu.memory_space<vmem>>, vector<1x128xf32>
    %2 = vector.broadcast %0 : vector<2x1xf32> to vector<2x128xf32>
    %3 = vector.broadcast %1 : vector<1x128xf32> to vector<2x128xf32>
    %4 = arith.mulf %2, %3 : vector<2x128xf32>
    %c0_3 = arith.constant 0 : index
    %c128 = arith.constant 128 : index
    %5 = vector.load %arg6[%c0_3, %c128] : memref<1x4352xf32, #tpu.memory_space<vmem>>, vector<1x128xf32>
    %6 = vector.broadcast %5 : vector<1x128xf32> to vector<2x128xf32>
    %7 = arith.addf %4, %6 : vector<2x128xf32>
    %8 = math.sin %7 : vector<2x128xf32>
    %9 = arith.truncf %8 : vector<2x128xf32> to vector<2x128xbf16>
    %c0_4 = arith.constant 0 : index
    %c0_5 = arith.constant 0 : index
    %10 = vector.load %arg4[%c0_4, %c0_5] : memref<128x640xbf16, #tpu.memory_space<vmem>>, vector<128x256xbf16>
    %cst = arith.constant dense<0.000000e+00> : vector<2x256xf32>
    %11 = tpu.matmul %9, %10, %cst {dimension_numbers = #tpu.dot_dimension_numbers<[1], [0], [0], [1], [0, 0, 1, 1], [], []>} : vector<2x128xbf16>, vector<128x256xbf16>, vector<2x256xf32> -> vector<2x256xf32>
    %c0_6 = arith.constant 0 : index
    %c256 = arith.constant 256 : index
    %12 = vector.load %arg6[%c0_6, %c256] : memref<1x4352xf32, #tpu.memory_space<vmem>>, vector<1x256xf32>
    %13 = vector.broadcast %12 : vector<1x256xf32> to vector<2x256xf32>
    %14 = arith.addf %11, %13 : vector<2x256xf32>
    %15 = arith.truncf %14 : vector<2x256xf32> to vector<2x256xbf16>
    %c0_7 = arith.constant 0 : index
    %c0_8 = arith.constant 0 : index
    %16 = vector.load %arg5[%c0_7, %c0_8] : memref<768x128xbf16, #tpu.memory_space<vmem>>, vector<256x128xbf16>
    %cst_9 = arith.constant dense<0.000000e+00> : vector<2x128xf32>
    %17 = tpu.matmul %15, %16, %cst_9 {dimension_numbers = #tpu.dot_dimension_numbers<[1], [0], [0], [1], [0, 0, 1, 1], [], []>} : vector<2x256xbf16>, vector<256x128xbf16>, vector<2x128xf32> -> vector<2x128xf32>
    %c0_10 = arith.constant 0 : index
    %c512 = arith.constant 512 : index
    %18 = vector.load %arg6[%c0_10, %c512] : memref<1x4352xf32, #tpu.memory_space<vmem>>, vector<1x128xf32>
    %19 = vector.broadcast %18 : vector<1x128xf32> to vector<2x128xf32>
    %20 = arith.addf %17, %19 : vector<2x128xf32>
    %cst_11 = arith.constant dense<0.000000e+00> : vector<2xf32>
    %21 = vector.multi_reduction <add>, %20, %cst_11 [1] : vector<2x128xf32> to vector<2xf32>
    %22 = vector.shape_cast %21 : vector<2xf32> to vector<2x1xf32>
    %cst_12 = arith.constant 1.280000e+02 : f32
    %23 = vector.broadcast %cst_12 : f32 to vector<2x1xf32>
    %24 = arith.divf %22, %23 : vector<2x1xf32>
    %25 = vector.broadcast %24 : vector<2x1xf32> to vector<2x128xf32>
    %26 = arith.subf %20, %25 : vector<2x128xf32>
    %27 = arith.mulf %26, %26 : vector<2x128xf32>
    %cst_13 = arith.constant dense<0.000000e+00> : vector<2xf32>
    %28 = vector.multi_reduction <add>, %27, %cst_13 [1] : vector<2x128xf32> to vector<2xf32>
    %29 = vector.shape_cast %28 : vector<2xf32> to vector<2x1xf32>
    %cst_14 = arith.constant 1.280000e+02 : f32
    %30 = vector.broadcast %cst_14 : f32 to vector<2x1xf32>
    %31 = arith.divf %29, %30 : vector<2x1xf32>
    %cst_15 = arith.constant 9.99999974E-6 : f32
    %32 = vector.broadcast %cst_15 : f32 to vector<2x1xf32>
    %33 = arith.addf %31, %32 : vector<2x1xf32>
    %34 = math.rsqrt %33 : vector<2x1xf32>
    %35 = vector.broadcast %34 : vector<2x1xf32> to vector<2x128xf32>
    %36 = arith.mulf %26, %35 : vector<2x128xf32>
    %c0_16 = arith.constant 0 : index
    %c640 = arith.constant 640 : index
    %37 = vector.load %arg6[%c0_16, %c640] : memref<1x4352xf32, #tpu.memory_space<vmem>>, vector<1x128xf32>
    %38 = vector.broadcast %37 : vector<1x128xf32> to vector<2x128xf32>
    %39 = arith.mulf %36, %38 : vector<2x128xf32>
    %c0_17 = arith.constant 0 : index
    %c768 = arith.constant 768 : index
    %40 = vector.load %arg6[%c0_17, %c768] : memref<1x4352xf32, #tpu.memory_space<vmem>>, vector<1x128xf32>
    %41 = vector.broadcast %40 : vector<1x128xf32> to vector<2x128xf32>
    %42 = arith.addf %39, %41 : vector<2x128xf32>
    %cst_18 = arith.constant 0.00999999977 : f32
    %43 = vector.broadcast %cst_18 : f32 to vector<2x128xf32>
    %44 = arith.mulf %43, %42 : vector<2x128xf32>
    %45 = arith.maximumf %42, %44 : vector<2x128xf32>
    %46 = arith.truncf %45 : vector<2x128xf32> to vector<2x128xbf16>
    %c0_19 = arith.constant 0 : index
    %c256_20 = arith.constant 256 : index
    %47 = vector.load %arg4[%c0_19, %c256_20] : memref<128x640xbf16, #tpu.memory_space<vmem>>, vector<128x128xbf16>
    %cst_21 = arith.constant dense<0.000000e+00> : vector<2x128xf32>
    %48 = tpu.matmul %46, %47, %cst_21 {dimension_numbers = #tpu.dot_dimension_numbers<[1], [0], [0], [1], [0, 0, 1, 1], [], []>} : vector<2x128xbf16>, vector<128x128xbf16>, vector<2x128xf32> -> vector<2x128xf32>
    %c0_22 = arith.constant 0 : index
    %c896 = arith.constant 896 : index
    %49 = vector.load %arg6[%c0_22, %c896] : memref<1x4352xf32, #tpu.memory_space<vmem>>, vector<1x128xf32>
    %50 = vector.broadcast %49 : vector<1x128xf32> to vector<2x128xf32>
    %51 = arith.addf %48, %50 : vector<2x128xf32>
    %cst_23 = arith.constant dense<0.000000e+00> : vector<2xf32>
    %52 = vector.multi_reduction <add>, %51, %cst_23 [1] : vector<2x128xf32> to vector<2xf32>
    %53 = vector.shape_cast %52 : vector<2xf32> to vector<2x1xf32>
    %cst_24 = arith.constant 1.280000e+02 : f32
    %54 = vector.broadcast %cst_24 : f32 to vector<2x1xf32>
    %55 = arith.divf %53, %54 : vector<2x1xf32>
    %56 = vector.broadcast %55 : vector<2x1xf32> to vector<2x128xf32>
    %57 = arith.subf %51, %56 : vector<2x128xf32>
    %58 = arith.mulf %57, %57 : vector<2x128xf32>
    %cst_25 = arith.constant dense<0.000000e+00> : vector<2xf32>
    %59 = vector.multi_reduction <add>, %58, %cst_25 [1] : vector<2x128xf32> to vector<2xf32>
    %60 = vector.shape_cast %59 : vector<2xf32> to vector<2x1xf32>
    %cst_26 = arith.constant 1.280000e+02 : f32
    %61 = vector.broadcast %cst_26 : f32 to vector<2x1xf32>
    %62 = arith.divf %60, %61 : vector<2x1xf32>
    %cst_27 = arith.constant 9.99999974E-6 : f32
    %63 = vector.broadcast %cst_27 : f32 to vector<2x1xf32>
    %64 = arith.addf %62, %63 : vector<2x1xf32>
    %65 = math.rsqrt %64 : vector<2x1xf32>
    %66 = vector.broadcast %65 : vector<2x1xf32> to vector<2x128xf32>
    %67 = arith.mulf %57, %66 : vector<2x128xf32>
    %c0_28 = arith.constant 0 : index
    %c1024 = arith.constant 1024 : index
    %68 = vector.load %arg6[%c0_28, %c1024] : memref<1x4352xf32, #tpu.memory_space<vmem>>, vector<1x128xf32>
    %69 = vector.broadcast %68 : vector<1x128xf32> to vector<2x128xf32>
    %70 = arith.mulf %67, %69 : vector<2x128xf32>
    %c0_29 = arith.constant 0 : index
    %c1152 = arith.constant 1152 : index
    %71 = vector.load %arg6[%c0_29, %c1152] : memref<1x4352xf32, #tpu.memory_space<vmem>>, vector<1x128xf32>
    %72 = vector.broadcast %71 : vector<1x128xf32> to vector<2x128xf32>
    %73 = arith.addf %70, %72 : vector<2x128xf32>
    %cst_30 = arith.constant 0.00999999977 : f32
    %74 = vector.broadcast %cst_30 : f32 to vector<2x128xf32>
    %75 = arith.mulf %74, %73 : vector<2x128xf32>
    %76 = arith.maximumf %73, %75 : vector<2x128xf32>
    %77 = arith.truncf %76 : vector<2x128xf32> to vector<2x128xbf16>
    %c0_31 = arith.constant 0 : index
    %c384 = arith.constant 384 : index
    %78 = vector.load %arg4[%c0_31, %c384] : memref<128x640xbf16, #tpu.memory_space<vmem>>, vector<128x128xbf16>
    %cst_32 = arith.constant dense<0.000000e+00> : vector<2x128xf32>
    %79 = tpu.matmul %77, %78, %cst_32 {dimension_numbers = #tpu.dot_dimension_numbers<[1], [0], [0], [1], [0, 0, 1, 1], [], []>} : vector<2x128xbf16>, vector<128x128xbf16>, vector<2x128xf32> -> vector<2x128xf32>
    %c0_33 = arith.constant 0 : index
    %c0_34 = arith.constant 0 : index
    %80 = vector.load %arg2[%c0_33, %c0_34] : memref<2x512xf32, #tpu.memory_space<vmem>>, vector<2x512xf32>
    %81 = arith.truncf %80 : vector<2x512xf32> to vector<2x512xbf16>
    %c256_35 = arith.constant 256 : index
    %c0_36 = arith.constant 0 : index
    %82 = vector.load %arg5[%c256_35, %c0_36] : memref<768x128xbf16, #tpu.memory_space<vmem>>, vector<512x128xbf16>
    %cst_37 = arith.constant dense<0.000000e+00> : vector<2x128xf32>
    %83 = tpu.matmul %81, %82, %cst_37 {dimension_numbers = #tpu.dot_dimension_numbers<[1], [0], [0], [1], [0, 0, 1, 1], [], []>} : vector<2x512xbf16>, vector<512x128xbf16>, vector<2x128xf32> -> vector<2x128xf32>
    %84 = arith.addf %79, %83 : vector<2x128xf32>
    %c0_38 = arith.constant 0 : index
    %c1280 = arith.constant 1280 : index
    %85 = vector.load %arg6[%c0_38, %c1280] : memref<1x4352xf32, #tpu.memory_space<vmem>>, vector<1x128xf32>
    %86 = vector.broadcast %85 : vector<1x128xf32> to vector<2x128xf32>
    %87 = arith.addf %84, %86 : vector<2x128xf32>
    %cst_39 = arith.constant dense<0.000000e+00> : vector<2xf32>
    %88 = vector.multi_reduction <add>, %87, %cst_39 [1] : vector<2x128xf32> to vector<2xf32>
    %89 = vector.shape_cast %88 : vector<2xf32> to vector<2x1xf32>
    %cst_40 = arith.constant 1.280000e+02 : f32
    %90 = vector.broadcast %cst_40 : f32 to vector<2x1xf32>
    %91 = arith.divf %89, %90 : vector<2x1xf32>
    %92 = vector.broadcast %91 : vector<2x1xf32> to vector<2x128xf32>
    %93 = arith.subf %87, %92 : vector<2x128xf32>
    %94 = arith.mulf %93, %93 : vector<2x128xf32>
    %cst_41 = arith.constant dense<0.000000e+00> : vector<2xf32>
    %95 = vector.multi_reduction <add>, %94, %cst_41 [1] : vector<2x128xf32> to vector<2xf32>
    %96 = vector.shape_cast %95 : vector<2xf32> to vector<2x1xf32>
    %cst_42 = arith.constant 1.280000e+02 : f32
    %97 = vector.broadcast %cst_42 : f32 to vector<2x1xf32>
    %98 = arith.divf %96, %97 : vector<2x1xf32>
    %cst_43 = arith.constant 9.99999974E-6 : f32
    %99 = vector.broadcast %cst_43 : f32 to vector<2x1xf32>
    %100 = arith.addf %98, %99 : vector<2x1xf32>
    %101 = math.rsqrt %100 : vector<2x1xf32>
    %102 = vector.broadcast %101 : vector<2x1xf32> to vector<2x128xf32>
    %103 = arith.mulf %93, %102 : vector<2x128xf32>
    %c0_44 = arith.constant 0 : index
    %c1408 = arith.constant 1408 : index
    %104 = vector.load %arg6[%c0_44, %c1408] : memref<1x4352xf32, #tpu.memory_space<vmem>>, vector<1x128xf32>
    %105 = vector.broadcast %104 : vector<1x128xf32> to vector<2x128xf32>
    %106 = arith.mulf %103, %105 : vector<2x128xf32>
    %c0_45 = arith.constant 0 : index
    %c1536 = arith.constant 1536 : index
    %107 = vector.load %arg6[%c0_45, %c1536] : memref<1x4352xf32, #tpu.memory_space<vmem>>, vector<1x128xf32>
    %108 = vector.broadcast %107 : vector<1x128xf32> to vector<2x128xf32>
    %109 = arith.addf %106, %108 : vector<2x128xf32>
    %cst_46 = arith.constant 0.00999999977 : f32
    %110 = vector.broadcast %cst_46 : f32 to vector<2x128xf32>
    %111 = arith.mulf %110, %109 : vector<2x128xf32>
    %112 = arith.maximumf %109, %111 : vector<2x128xf32>
    %113 = arith.truncf %112 : vector<2x128xf32> to vector<2x128xbf16>
    %c0_47 = arith.constant 0 : index
    %c512_48 = arith.constant 512 : index
    %114 = vector.load %arg4[%c0_47, %c512_48] : memref<128x640xbf16, #tpu.memory_space<vmem>>, vector<128x128xbf16>
    %cst_49 = arith.constant dense<0.000000e+00> : vector<2x128xf32>
    %115 = tpu.matmul %113, %114, %cst_49 {dimension_numbers = #tpu.dot_dimension_numbers<[1], [0], [0], [1], [0, 0, 1, 1], [], []>} : vector<2x128xbf16>, vector<128x128xbf16>, vector<2x128xf32> -> vector<2x128xf32>
    %c0_50 = arith.constant 0 : index
    %c1664 = arith.constant 1664 : index
    %116 = vector.load %arg6[%c0_50, %c1664] : memref<1x4352xf32, #tpu.memory_space<vmem>>, vector<1x128xf32>
    %117 = vector.broadcast %116 : vector<1x128xf32> to vector<2x128xf32>
    %118 = arith.addf %115, %117 : vector<2x128xf32>
    %cst_51 = arith.constant dense<0.000000e+00> : vector<2xf32>
    %119 = vector.multi_reduction <add>, %118, %cst_51 [1] : vector<2x128xf32> to vector<2xf32>
    %120 = vector.shape_cast %119 : vector<2xf32> to vector<2x1xf32>
    %cst_52 = arith.constant 1.280000e+02 : f32
    %121 = vector.broadcast %cst_52 : f32 to vector<2x1xf32>
    %122 = arith.divf %120, %121 : vector<2x1xf32>
    %123 = vector.broadcast %122 : vector<2x1xf32> to vector<2x128xf32>
    %124 = arith.subf %118, %123 : vector<2x128xf32>
    %125 = arith.mulf %124, %124 : vector<2x128xf32>
    %cst_53 = arith.constant dense<0.000000e+00> : vector<2xf32>
    %126 = vector.multi_reduction <add>, %125, %cst_53 [1] : vector<2x128xf32> to vector<2xf32>
    %127 = vector.shape_cast %126 : vector<2xf32> to vector<2x1xf32>
    %cst_54 = arith.constant 1.280000e+02 : f32
    %128 = vector.broadcast %cst_54 : f32 to vector<2x1xf32>
    %129 = arith.divf %127, %128 : vector<2x1xf32>
    %cst_55 = arith.constant 9.99999974E-6 : f32
    %130 = vector.broadcast %cst_55 : f32 to vector<2x1xf32>
    %131 = arith.addf %129, %130 : vector<2x1xf32>
    %132 = math.rsqrt %131 : vector<2x1xf32>
    %133 = vector.broadcast %132 : vector<2x1xf32> to vector<2x128xf32>
    %134 = arith.mulf %124, %133 : vector<2x128xf32>
    %c0_56 = arith.constant 0 : index
    %c1792 = arith.constant 1792 : index
    %135 = vector.load %arg6[%c0_56, %c1792] : memref<1x4352xf32, #tpu.memory_space<vmem>>, vector<1x128xf32>
    %136 = vector.broadcast %135 : vector<1x128xf32> to vector<2x128xf32>
    %137 = arith.mulf %134, %136 : vector<2x128xf32>
    %c0_57 = arith.constant 0 : index
    %c1920 = arith.constant 1920 : index
    %138 = vector.load %arg6[%c0_57, %c1920] : memref<1x4352xf32, #tpu.memory_space<vmem>>, vector<1x128xf32>
    %139 = vector.broadcast %138 : vector<1x128xf32> to vector<2x128xf32>
    %140 = arith.addf %137, %139 : vector<2x128xf32>
    %cst_58 = arith.constant 0.00999999977 : f32
    %141 = vector.broadcast %cst_58 : f32 to vector<2x128xf32>
    %142 = arith.mulf %141, %140 : vector<2x128xf32>
    %143 = arith.maximumf %140, %142 : vector<2x128xf32>
    %144 = arith.truncf %143 : vector<2x128xf32> to vector<2x128xbf16>
    tpu.wait_dma2 semaphore(%arg10 : memref<!tpu.dma_semaphore, #tpu.memory_space<semaphore_mem>>) src(%arg7 : memref<128x1536xbf16, #tpu.memory_space<any>>) dst(%arg9 : memref<128x1536xbf16, #tpu.memory_space<vmem>>)
    %c0_59 = arith.constant 0 : index
    %c0_60 = arith.constant 0 : index
    %145 = vector.load %arg9[%c0_59, %c0_60] : memref<128x1536xbf16, #tpu.memory_space<vmem>>, vector<128x768xbf16>
    %cst_61 = arith.constant dense<0.000000e+00> : vector<2x768xf32>
    %146 = tpu.matmul %144, %145, %cst_61 {dimension_numbers = #tpu.dot_dimension_numbers<[1], [0], [0], [1], [0, 0, 1, 1], [], []>} : vector<2x128xbf16>, vector<128x768xbf16>, vector<2x768xf32> -> vector<2x768xf32>
    %c0_62 = arith.constant 0 : index
    %c2048 = arith.constant 2048 : index
    %147 = vector.load %arg6[%c0_62, %c2048] : memref<1x4352xf32, #tpu.memory_space<vmem>>, vector<1x768xf32>
    %148 = vector.broadcast %147 : vector<1x768xf32> to vector<2x768xf32>
    %149 = arith.addf %146, %148 : vector<2x768xf32>
    %c0_63 = arith.constant 0 : index
    %c768_64 = arith.constant 768 : index
    %150 = vector.load %arg8[%c0_63, %c768_64] : memref<2x1536xf32, #tpu.memory_space<vmem>>, vector<2x768xf32>
    tpu.vector_store %arg8[%c0_63, %c768_64], %149 {strides = array<i32>} : memref<2x1536xf32, #tpu.memory_space<vmem>>, vector<2x768xf32>,
    %c0_65 = arith.constant 0 : index
    %c768_66 = arith.constant 768 : index
    %151 = vector.load %arg9[%c0_65, %c768_66] : memref<128x1536xbf16, #tpu.memory_space<vmem>>, vector<128x768xbf16>
    %cst_67 = arith.constant dense<0.000000e+00> : vector<2x768xf32>
    %152 = tpu.matmul %77, %151, %cst_67 {dimension_numbers = #tpu.dot_dimension_numbers<[1], [0], [0], [1], [0, 0, 1, 1], [], []>} : vector<2x128xbf16>, vector<128x768xbf16>, vector<2x768xf32> -> vector<2x768xf32>
    %c0_68 = arith.constant 0 : index
    %c2816 = arith.constant 2816 : index
    %153 = vector.load %arg6[%c0_68, %c2816] : memref<1x4352xf32, #tpu.memory_space<vmem>>, vector<1x768xf32>
    %154 = vector.broadcast %153 : vector<1x768xf32> to vector<2x768xf32>
    %155 = arith.addf %152, %154 : vector<2x768xf32>
    %c0_69 = arith.constant 0 : index
    %c0_70 = arith.constant 0 : index
    %156 = vector.load %arg3[%c0_69, %c0_70] : memref<2x768xf32, #tpu.memory_space<vmem>>, vector<2x768xf32>
    %157 = arith.addf %155, %156 : vector<2x768xf32>
    %158 = arith.mulf %157, %157 : vector<2x768xf32>
    %cst_71 = arith.constant dense<0.000000e+00> : vector<2xf32>
    %159 = vector.multi_reduction <add>, %158, %cst_71 [1] : vector<2x768xf32> to vector<2xf32>
    %160 = vector.shape_cast %159 : vector<2xf32> to vector<2x1xf32>
    %cst_72 = arith.constant 1.000000e-24 : f32
    %161 = vector.broadcast %cst_72 : f32 to vector<2x1xf32>
    %162 = arith.maximumf %160, %161 : vector<2x1xf32>
    %163 = math.rsqrt %162 : vector<2x1xf32>
    %164 = vector.broadcast %163 : vector<2x1xf32> to vector<2x768xf32>
    %165 = arith.mulf %157, %164 : vector<2x768xf32>
    %c0_73 = arith.constant 0 : index
    %c3584 = arith.constant 3584 : index
    %166 = vector.load %arg6[%c0_73, %c3584] : memref<1x4352xf32, #tpu.memory_space<vmem>>, vector<1x768xf32>
    %167 = vector.broadcast %166 : vector<1x768xf32> to vector<2x768xf32>
    %168 = arith.mulf %165, %167 : vector<2x768xf32>
    %c0_74 = arith.constant 0 : index
    %c0_75 = arith.constant 0 : index
    %169 = vector.load %arg8[%c0_74, %c0_75] : memref<2x1536xf32, #tpu.memory_space<vmem>>, vector<2x768xf32>
    tpu.vector_store %arg8[%c0_74, %c0_75], %168 {strides = array<i32>} : memref<2x1536xf32, #tpu.memory_space<vmem>>, vector<2x768xf32>,
    return
  }
  func.func @transform_0(%arg0: i32) -> (i32, i32) {
    %c0_i32 = arith.constant 0 : i32
    %c0_i32_0 = arith.constant 0 : i32
    return %arg0, %c0_i32 : i32, i32
  }
  func.func @transform_1(%arg0: i32) -> (i32, i32) {
    %c0_i32 = arith.constant 0 : i32
    %c0_i32_0 = arith.constant 0 : i32
    return %arg0, %c0_i32 : i32, i32
  }
  func.func @transform_2(%arg0: i32) -> (i32, i32) {
    %c0_i32 = arith.constant 0 : i32
    %c0_i32_0 = arith.constant 0 : i32
    return %arg0, %c0_i32 : i32, i32
  }
  func.func @transform_3(%arg0: i32) -> (i32, i32) {
    %c0_i32 = arith.constant 0 : i32
    %c0_i32_0 = arith.constant 0 : i32
    %c0_i32_1 = arith.constant 0 : i32
    return %c0_i32, %c0_i32_0 : i32, i32
  }
  func.func @transform_4(%arg0: i32) -> (i32, i32) {
    %c0_i32 = arith.constant 0 : i32
    %c0_i32_0 = arith.constant 0 : i32
    %c0_i32_1 = arith.constant 0 : i32
    return %c0_i32, %c0_i32_0 : i32, i32
  }
  func.func @transform_5(%arg0: i32) -> (i32, i32) {
    %c0_i32 = arith.constant 0 : i32
    %c0_i32_0 = arith.constant 0 : i32
    %c0_i32_1 = arith.constant 0 : i32
    return %c0_i32, %c0_i32_0 : i32, i32
  }
  func.func @transform_7(%arg0: i32) -> (i32, i32) {
    %c0_i32 = arith.constant 0 : i32
    %c0_i32_0 = arith.constant 0 : i32
    return %arg0, %c0_i32 : i32, i32
  }
}

</mosaic_0001>

<bundles_post_ra>
// kernel: mapper_forward.1
= control target key start
LH: loop header
LB: loop body
LE: loop exit
PB: predicated region body
PF: predicated region fallthrough
CT: control target
= control target key end

     0   :  { %12 = vsyncpa [#allocation5], 0  ;;  %s3449_s0 = inlined_call_operand.vmem [shape: f32[2,1], index: 0, kind: input, shape index: {}]   ;;  %s3450_s1 = inlined_call_operand.vmem [shape: f32[2,512], index: 1, kind: input, shape index: {}]   ;;  %s3451_s2 = inlined_call_operand.hbm [shape: f32[2,768], index: 2, kind: input, shape index: {}]   ;;  %s3452_s3 = inlined_call_operand.hbm [shape: bf16[128,640], index: 3, kind: input, shape index: {}]   ;;  %s3453_s4 = inlined_call_operand.hbm [shape: bf16[768,128], index: 4, kind: input, shape index: {}]   ;;  %s3454_s5 = inlined_call_operand.hbm [shape: f32[1,4352], index: 5, kind: input, shape index: {}]   ;;  %s3455_s6 = inlined_call_operand.hbm [shape: bf16[128,1536], index: 6, kind: input, shape index: {}]   ;;  %s3456_s7 = inlined_call_operand.hbm [shape: f32[2,1536], index: 7, kind: output, shape index: {}]  }
   0x1   :  { %13 = vsyncpa [#allocation8], 0 }
   0x2   :  { %14 = vsyncpa [#allocation11], 0 }
   0x3   :  { %15 = vsyncpa [#allocation6], 0  ;;  %s3226_s24 = smov [#allocation7]  }
   0x4   :  { %s35_s25 = sshll.u32 %s3226_s24, 4  ;;  %s36_s25 = int_to_ptr.vmem [resolvable:$true] %s35_s25 }
   0x5   :  { %s3104_s26 = scalar_lea.vmem %s36_s25, 5120  ;;  %p3109_p1 = scmp.lt.s32.totalorder %s36_s25, %s36_s25 }
   0x6   :  { %p3105_p0 = scmp.ne.s32.totalorder %s36_s25, %s3104_s26  ;;  %p3110_p2 = scmp.lt.s32.totalorder %s3104_s26, %s3104_s26 }
   0x8   :  { %p3111_p3 = por %p3110_p2, %p3109_p1 }
   0xa   :  { %p3112_p4 = pnand %p3111_p3, %p3105_p0 }
   0xc   :  { %3115 = shalt.err (!%p3112_p4)
}
   0xd   :  { %s3227_s27 = smov 320   ;;  %s3228_s28 = smov 20  }
   0xe   :  { %41 = dma.hbm_to_vmem [thread:$0]  %s3452_s3, 5120, %s36_s25, [#allocation8], %s3227_s27, %s3227_s27, %s3228_s28  }
   0xf   :  { %s3229_s8 = smov [#allocation4]   ;;  %s3230_s10 = smov [#allocation9]  }
  0x10   :  { %s26_s9 = sshll.u32 %s3229_s8, 4  ;;  %s47_s11 = sshll.u32 %s3230_s10, 4  ;;  %s27_s9 = int_to_ptr.vmem [resolvable:$true] %s26_s9  ;;  %s48_s11 = int_to_ptr.vmem [resolvable:$true] %s47_s11 }
  0x11   :  { %s3124_s12 = scalar_lea.vmem %s27_s9, 192  ;;  %p3129_p6 = scmp.lt.s32.totalorder %s27_s9, %s27_s9 }
  0x12   :  { %p3125_p5 = scmp.ne.s32.totalorder %s27_s9, %s3124_s12  ;;  %p3130_p7 = scmp.lt.s32.totalorder %s3124_s12, %s3124_s12 }
  0x14   :  { %p3131_p8 = por %p3130_p7, %p3129_p6 }
  0x16   :  { %p3132_p9 = pnand %p3131_p8, %p3125_p5 }
  0x18   :  { %3135 = shalt.err (!%p3132_p9)
}
  0x19   :  { %29 = dma.hbm_to_vmem [thread:$0]  %s3451_s2, 192, %s27_s9, [#allocation5]  }
  0x1a   :  { %s3144_s15 = scalar_lea.vmem %s48_s11, 6144  ;;  %p3149_p11 = scmp.lt.s32.totalorder %s48_s11, %s48_s11 }
  0x1b   :  { %p3145_p10 = scmp.ne.s32.totalorder %s48_s11, %s3144_s15  ;;  %p3150_p12 = scmp.lt.s32.totalorder %s3144_s15, %s3144_s15 }
  0x1d   :  { %p3151_p13 = por %p3150_p12, %p3149_p11 }
  0x1f   :  { %p3152_p0 = pnand %p3151_p13, %p3145_p10 }
  0x21   :  { %3155 = shalt.err (!%p3152_p0)
}
  0x22   :  { %s3231_s3 = smov 64   ;;  %s3232_s16 = smov 4  }
  0x23   :  { %53 = dma.hbm_to_vmem [thread:$0]  %s3453_s4, 6144, %s48_s11, [#allocation8], %s3231_s3, %s3231_s3, %s3232_s16  }
  0x24   :  { %s3233_s19 = smov [#allocation10]  }
  0x25   :  { %s60_s20 = sshll.u32 %s3233_s19, 4  ;;  %s61_s20 = int_to_ptr.vmem [resolvable:$true] %s60_s20 }
  0x26   :  { %s3164_s21 = scalar_lea.vmem %s61_s20, 544  ;;  %p3169_p2 = scmp.lt.s32.totalorder %s61_s20, %s61_s20 }
  0x27   :  { %p3165_p1 = scmp.ne.s32.totalorder %s61_s20, %s3164_s21  ;;  %p3170_p3 = scmp.lt.s32.totalorder %s3164_s21, %s3164_s21 }
  0x29   :  { %p3171_p4 = por %p3170_p3, %p3169_p2 }
  0x2b   :  { %p3172_p5 = pnand %p3171_p4, %p3165_p1 }
  0x2d   :  { %3175 = shalt.err (!%p3172_p5)
}
  0x2e   :  { %63 = dma.hbm_to_vmem [thread:$0]  %s3454_s5, 544, %s61_s20, [#allocation11]  }
  0x2f   :  { %3216 = dma.done.wait [#allocation5], 192  }
  0x30   :  { %3217 = vsyncadd [#allocation5], 4294967104 }
  0x31   :  { %3218 = dma.done.wait [#allocation8], 11264  }
  0x32   :  { %3219 = vsyncadd [#allocation8], 4294956032 }
  0x33   :  { %3220 = dma.done.wait [#allocation11], 544  }
  0x34   :  { %3221 = vsyncadd [#allocation11], 4294966752  ;;  %v3234_v0 = vmov 0   ;;  %v88_v1 = vld [vmem:[%s3449_s0] sm:$0x3]  ;;  %v2865_v18 = vld [vmem:[#allocation9 + $0x78] sm:$0xff]  }
  0x35   :  { %2840 = vset.pattern.permute.xlu0 %v3234_v0  ;;  %355 = vmatprep.mubr.bf16.mxu0 %v3234_v0  ;;  %v2841_v2 = vld [vmem:[#allocation7 + $0x11c] ss:$20 sps:$4 sm:$0xff]   ;;  %v2843_v3 = vld [vmem:[#allocation7 + $0x118] ss:$20 sps:$4 sm:$0xff]   ;;  %v2844_v4 = vld [vmem:[#allocation7 + $0xf4] ss:$20 sps:$4 sm:$0xff]  }
  0x36   :  { %92 = vperm.xlu0 %2840, %v88_v1   ;;  %323 = vmatprep.subr.bf16.mxu0 %v2841_v2  ;;  %v2846_v5 = vld [vmem:[#allocation7 + $0xf0] ss:$20 sps:$4 sm:$0xff]   ;;  %v2847_v6 = vld [vmem:[#allocation7 + $0xcc] ss:$20 sps:$4 sm:$0xff]   ;;  %v2849_v7 = vld [vmem:[#allocation7 + $0xc8] ss:$20 sps:$4 sm:$0xff]  }
  0x37   :  { %324 = vmatpush1.bf16.msra.mxu0 %v2843_v3  ;;  %v2850_v8 = vld [vmem:[#allocation7 + $0xa4] ss:$20 sps:$4 sm:$0xff]   ;;  %v2852_v9 = vld [vmem:[#allocation7 + $0xa0] ss:$20 sps:$4 sm:$0xff]   ;;  %v2853_v10 = vld [vmem:[#allocation7 + $0x7c] ss:$20 sps:$4 sm:$0xff]   ;;  %2663 = vmatprep.subr.bf16.mxu1 %v2865_v18 }
  0x38   :  { %325 = vmatprep.subr.bf16.mxu0 %v2844_v4  ;;  %v2855_v11 = vld [vmem:[#allocation7 + $0x78] ss:$20 sps:$4 sm:$0xff]   ;;  %v2856_v12 = vld [vmem:[#allocation7 + $0x54] ss:$20 sps:$4 sm:$0xff]   ;;  %v2858_v13 = vld [vmem:[#allocation7 + $0x50] ss:$20 sps:$4 sm:$0xff]  }
  0x39   :  { %v2859_v14 = vld [vmem:[#allocation7 + $0x2c] ss:$20 sps:$4 sm:$0xff]   ;;  %v2861_v15 = vld [vmem:[#allocation7 + $0x28] ss:$20 sps:$4 sm:$0xff]   ;;  %v2862_v16 = vld [vmem:[#allocation7 + $0x4] ss:$20 sps:$4 sm:$0xff]  }
  0x3a   :  { %v2864_v17 = vld [vmem:[#allocation7] ss:$20 sps:$4 sm:$0xff]   ;;  %v2866_v19 = vld [vmem:[#allocation9 + $0x38] sm:$0xff]   ;;  %v2869_v22 = vld [vmem:[#allocation9 + $0x68] sm:$0xff]   ;;  %v3235_v45 = vmov 683565275  }
  0x3b   :  { %326 = vmatpush1.bf16.msra.mxu0 %v2846_v5  ;;  %v2867_v20 = vld [vmem:[#allocation9 + $0x70] sm:$0xff]   ;;  %2664 = vmatpush3.bf16.msra.mxu1 %v2866_v19  ;;  %v2870_v23 = vld [vmem:[#allocation9 + $0x28] sm:$0xff]   ;;  %v2871_v24 = vld [vmem:[#allocation9 + $0x60] sm:$0xff]   ;;  %v3236_v47 = vmov 2475754826   ;;  %vm541_vm13 = vcmask 1041408  }
  0x3c   :  { %327 = vmatprep.subr.bf16.mxu0 %v2847_v6  ;;  %v2868_v21 = vld [vmem:[#allocation9 + $0x30] sm:$0xff]   ;;  %2665 = vmatprep.subr.bf16.mxu1 %v2867_v20  ;;  %v2872_v25 = vld [vmem:[#allocation9 + $0x20] sm:$0xff]   ;;  %v2873_v26 = vld [vmem:[#allocation9 + $0x58] sm:$0xff]   ;;  %v3237_v50 = vmov 2131351028   ;;  %vm3242_vm14 = vmmov 0  }
  0x3d   :  { %v2874_v27 = vld [vmem:[#allocation9 + $0x18] sm:$0xff]   ;;  %v2875_v28 = vld [vmem:[#allocation9 + $0x50] sm:$0xff]   ;;  %v2457_v30 = vld [vmem:[#allocation10] ss:$0 sm:$0xff]  ;;  %v3238_v53 = vmov 2102212464  }
  0x3e   :  { %v2876_v29 = vld [vmem:[#allocation9 + $0x10] sm:$0xff]   ;;  %v2458_v31 = vld [vmem:[#allocation10 + $0x1] ss:$0 sm:$0xff]  ;;  %v3239_v56 = vmov 920167782  }
  0x3f   :  { %328 = vmatpush1.bf16.msra.mxu0 %v2849_v7  ;;  %2666 = vmatpush3.bf16.msra.mxu1 %v2868_v21  ;;  %v3240_v59 = vmov 1326507024  }
  0x40   :  { %329 = vmatprep.subr.bf16.mxu0 %v2850_v8  ;;  %2667 = vmatprep.subr.bf16.mxu1 %v2869_v22 }
  0x43   :  { %330 = vmatpush1.bf16.msra.mxu0 %v2852_v9  ;;  %2668 = vmatpush3.bf16.msra.mxu1 %v2870_v23 }
  0x44   :  { %331 = vmatprep.subr.bf16.mxu0 %v2853_v10  ;;  %2669 = vmatprep.subr.bf16.mxu1 %v2871_v24 }
  0x47   :  { %332 = vmatpush1.bf16.msra.mxu0 %v2855_v11  ;;  %2670 = vmatpush3.bf16.msra.mxu1 %v2872_v25 }
  0x48   :  { %333 = vmatprep.subr.bf16.mxu0 %v2856_v12  ;;  %2671 = vmatprep.subr.bf16.mxu1 %v2873_v26 }
  0x4b   :  { %334 = vmatpush1.bf16.msra.mxu0 %v2858_v13  ;;  %2672 = vmatpush3.bf16.msra.mxu1 %v2874_v27 }
  0x4c   :  { %335 = vmatprep.subr.bf16.mxu0 %v2859_v14  ;;  %2673 = vmatprep.subr.bf16.mxu1 %v2875_v28 }
  0x4f   :  { %336 = vmatpush1.bf16.msra.mxu0 %v2861_v15  ;;  %2674 = vmatpush3.bf16.msra.mxu1 %v2876_v29 }
  0x50   :  { %337 = vmatprep.subr.bf16.mxu0 %v2862_v16 }
  0x53   :  { %338 = vmatpush1.bf16.msra.mxu0 %v2864_v17 }
  0xb1   :  { %v93_v32 = vpop.permute.xlu0 %92 }
  0xb2   :  { %v101_v33 = vmul.f32 %v2457_v30, %v93_v32 }
  0xb4   :  { %v3303_v34 = vadd.f32 %v2458_v31, %v101_v33 }
  0xb6   :  { %v113_v35 = vand.u32 2139095040, %v3303_v34  ;;  %v110_v39 = vand.u32 2147483647, %v3303_v34  ;;  %vm112_vm7 = vcmp.lt.s32.totalorder %v3303_v34, 0  ;;  %vm202_vm12 = vweird.f32 %v3303_v34 }
  0xb8   :  { %v114_v36 = vshrl.u32 %v113_v35, 23  ;;  %v117_v42 = vand.u32 8388607, %v110_v39  ;;  %vm111_vm8 = vcmp.le.f32.partialorder %v110_v39, 0.7853982 }
  0xba   :  { %v2459_v37 = vadd.s32 4294967169, %v114_v36  ;;  %v118_v61 = vor.u32 8388608, %v117_v42 }
  0xbc   :  { %v120_v38 = vadd.s32 1, %v2459_v37  ;;  %v158_v12 = vshll.u32 %v118_v61, 8 }
  0xbe   :  { %vm121_vm0 = vcmp.gt.s32.totalorder %v120_v38, 0 }
  0xbf   :  { %v122_v40 = vsel %vm121_vm0, %v120_v38, 0 }
  0xc0   :  { %v124_v41 = vand.u32 31, %v122_v40  ;;  %v123_v44 = vshrl.u32 %v122_v40, 5 }
  0xc2   :  { %v125_v43 = vsub.s32 32, %v124_v41  ;;  %v127_v46 = vshll.u32 %v3235_v45, %v124_v41  ;;  %v130_v48 = vshll.u32 %v3236_v47, %v124_v41  ;;  %v133_v52 = vshll.u32 %v3237_v50, %v124_v41 }
  0xc3   :  { %v136_v55 = vshll.u32 %v3238_v53, %v124_v41  ;;  %v139_v58 = vshll.u32 %v3239_v56, %v124_v41  ;;  %vm142_vm1 = vcmp.lt.s32.totalorder %v123_v44, 1  ;;  %vm145_vm2 = vcmp.lt.s32.totalorder %v123_v44, 4 }
  0xc4   :  { %v128_v49 = vshrl.u32 %v3236_v47, %v125_v43  ;;  %v131_v51 = vshrl.u32 %v3237_v50, %v125_v43  ;;  %v134_v54 = vshrl.u32 %v3238_v53, %v125_v43  ;;  %v137_v57 = vshrl.u32 %v3239_v56, %v125_v43 }
  0xc5   :  { %v140_v60 = vshrl.u32 %v3240_v59, %v125_v43  ;;  %v126_v7 = vshrl.u32 %v3235_v45, %v125_v43  ;;  %vm144_vm3 = vcmp.lt.s32.totalorder %v123_v44, 3  ;;  %vm143_vm4 = vcmp.lt.s32.totalorder %v123_v44, 2 }
  0xc6   :  { %v129_v62 = vor.u32 %v128_v49, %v127_v46  ;;  %v132_v63 = vor.u32 %v131_v51, %v130_v48  ;;  %v135_v1 = vor.u32 %v134_v54, %v133_v52  ;;  %v138_v2 = vor.u32 %v137_v57, %v136_v55 }
  0xc7   :  { %v141_v3 = vor.u32 %v140_v60, %v139_v58 }
  0xc8   :  { %v147_v4 = vsel %vm145_vm2, %v135_v1, 2102212464  ;;  %v150_v5 = vsel %vm142_vm1, %v129_v62, %v132_v63  ;;  %v154_v6 = vsel %vm142_vm1, %v132_v63, %v135_v1  ;;  %v151_v8 = vsel %vm145_vm2, %v138_v2, 920167782 }
  0xc9   :  { %v155_v9 = vsel %vm145_vm2, %v141_v3, 1326507024  ;;  %v152_v10 = vsel %vm144_vm3, %v135_v1, %v151_v8  ;;  %v146_v13 = vsel %vm142_vm1, %v126_v7, %v129_v62  ;;  %v148_v14 = vsel %vm144_vm3, %v132_v63, %v147_v4  ;;  %v2878_v3 = vld [vmem:[#allocation9 + $0x8] sm:$0xff]   ;;  %v2879_v4 = vld [vmem:[#allocation9 + $0x40] sm:$0xff]  }
  0xca   :  { %v156_v11 = vsel %vm144_vm3, %v138_v2, %v155_v9  ;;  %v153_v15 = vsel %vm143_vm4, %v150_v5, %v152_v10  ;;  %v149_v21 = vsel %vm143_vm4, %v146_v13, %v148_v14  ;;  %v2877_v2 = vld [vmem:[#allocation9 + $0x48] sm:$0xff]   ;;  %v2880_v5 = vld [vmem:[#allocation9] sm:$0xff]  }
  0xcb   :  { %v157_v16 = vsel %vm143_vm4, %v154_v6, %v156_v11  ;;  %v3312_v19 = vmul.u32.u64.low %v158_v12, %v153_v15  ;;  %v3313_v20 = vmul.u32.u64.high %v158_v12, %v153_v15, %v3312_v19  ;;  %v165_v23 = vmul.u32 %v158_v12, %v149_v21  ;;  %2675 = vmatprep.subr.bf16.mxu1 %v2877_v2  ;;  %v231_v9 = vld [vmem:[#allocation10 + $0x2] sm:$0x3]  ;;  %v2892_v2 = vld [vmem:[#allocation9 + $0x178] sm:$0xff]  }
  0xcc   :  { %v3309_v17 = vmul.u32.u64.low %v158_v12, %v157_v16  ;;  %v3310_v18 = vmul.u32.u64.high %v158_v12, %v157_v16, %v3309_v17  ;;  %2676 = vmatpush3.bf16.msra.mxu1 %v2878_v3  ;;  %v233_v6 = vlaneseq  ;;  %v2894_v3 = vld [vmem:[#allocation9 + $0x138] sm:$0xff]  }
  0xcd   :  { %v168_v22 = vadd.s32 1, %v3313_v20  ;;  %2677 = vmatprep.subr.bf16.mxu1 %v2879_v4  ;;  %v3243_v4 = vmov 1983009808  }
  0xce   :  { %vm167_vm5 = vc.u32 %v3310_v18, %v3312_v19  ;;  %v166_v36 = vadd.s32 %v3312_v19, %v3310_v18  ;;  %v3324_v7 = vshrl.u32 %v233_v6, 7  ;;  %v2896_v6 = vld [vmem:[#allocation9 + $0x170] sm:$0xff]  }
  0xcf   :  { %v169_v24 = vsel %vm167_vm5, %v168_v22, %v3313_v20  ;;  %v2479_v22 = vld [vmem:[#allocation10 + $0x4] ss:$0 sm:$0xff] }
  0xd0   :  { %v170_v25 = vadd.s32 %v169_v24, %v165_v23  ;;  %2678 = vmatpush3.bf16.msra.mxu1 %v2880_v5  ;;  %v3327_v8 = vsub.s32 0, %v3324_v7  ;;  %v738_v5 = vunpack.c.l.s4 %v3243_v4 }
  0xd2   :  { %v171_v26 = vadd.s32 536870912, %v170_v25  ;;  %v236_v10 = vrot.slane %v231_v9, %v3327_v8 }
  0xd4   :  { %v172_v27 = vshrl.u32 %v171_v26, 30 }
  0xd6   :  { %v173_v28 = vshll.u32 %v172_v27, 30  ;;  %v196_v50 = vsub.s32 4, %v172_v27 }
  0xd8   :  { %v174_v29 = vsub.s32 %v170_v25, %v173_v28  ;;  %v197_v53 = vsel %vm112_vm7, %v196_v50, %v172_v27  ;;  %v2881_v28 = vld [vmem:[#allocation7 + $0x120] ss:$20 sps:$4 sm:$0xff]   ;;  %v2497_v50 = vld [vmem:[#allocation10 + $0x6] ss:$0 sm:$0xff] }
  0xd9   :  { %v199_v54 = vsel %vm111_vm8, 0, %v197_v53 }
  0xda   :  { %v176_v30 = vsub.s32 0, %v174_v29  ;;  %v203_v55 = vadd.s32 3, %v199_v54 }
  0xdc   :  { %v2460_v31 = vmin.u32 %v176_v30, %v174_v29  ;;  %v204_v56 = vand.u32 3, %v203_v55 }
  0xde   :  { %v178_v32 = vclz %v2460_v31  ;;  %vm209_vm9 = vcmp.eq.s32.totalorder %v204_v56, 2  ;;  %vm206_vm10 = vcmp.eq.s32.totalorder %v204_v56, 0  ;;  %vm205_vm11 = vcmp.lt.s32.totalorder %v204_v56, 2  ;;  %v2498_v56 = vld [vmem:[#allocation10 + $0x7] ss:$0 sm:$0xff] }
  0xe0   :  { %v2461_v33 = vadd.s32 4294967294, %v178_v32 }
  0xe2   :  { %vm2462_vm6 = vcmp.lt.s32.totalorder %v2461_v33, 0 }
  0xe3   :  { %v181_v35 = vsel %vm2462_vm6, 0, %v2461_v33 }
  0xe4   :  { %v182_v37 = vsub.s32 32, %v181_v35  ;;  %v186_v38 = vsub.s32 4294967266, %v181_v35  ;;  %v183_v40 = vshll.u32 %v174_v29, %v181_v35  ;;  %v3241_v29 = vmov 0.0  }
  0xe5   :  { %2756 = vmatprep.subr.bf16.mxu0 %v3241_v29 }
  0xe6   :  { %v184_v41 = vshrl.u32 %v166_v36, %v182_v37  ;;  %v187_v42 = vadd.s32 127, %v186_v38  ;;  %v2882_v36 = vld [vmem:[#allocation7 + $0xf8] ss:$20 sps:$4 sm:$0xff]   ;;  %v2883_v37 = vld [vmem:[#allocation7 + $0xd0] ss:$20 sps:$4 sm:$0xff]  }
  0xe7   :  { %v2884_v38 = vld [vmem:[#allocation7 + $0xa8] ss:$20 sps:$4 sm:$0xff]  }
  0xe8   :  { %v185_v43 = vor.u32 %v184_v41, %v183_v40  ;;  %v188_v44 = vshll.u32 %v187_v42, 23  ;;  %v2885_v40 = vld [vmem:[#allocation7 + $0x80] ss:$20 sps:$4 sm:$0xff]   ;;  %v2886_v41 = vld [vmem:[#allocation7 + $0x58] ss:$20 sps:$4 sm:$0xff]  }
  0xe9   :  { %v2887_v42 = vld [vmem:[#allocation7 + $0x30] ss:$20 sps:$4 sm:$0xff]  }
  0xea   :  { %v189_v45 = vor.u32 4788187, %v188_v44  ;;  %v192_v47 = vcvt.s32.f32 %v185_v43  ;;  %v2888_v43 = vld [vmem:[#allocation7 + $0x8] ss:$20 sps:$4 sm:$0xff]  }
  0xec   :  { %v190_v46 = vand.u32 2147483647, %v189_v45 }
  0xee   :  { %v193_v48 = vmul.f32 %v192_v47, %v190_v46 }
  0xf0   :  { %v194_v49 = vxor.u32 2147483648, %v193_v48 }
  0xf2   :  { %v195_v51 = vsel %vm112_vm7, %v194_v49, %v193_v48  ;;  %v2496_v48 = vld [vmem:[#allocation10 + $0x5] ss:$0 sm:$0xff] }
  0xf3   :  { %v198_v52 = vsel %vm111_vm8, %v3303_v34, %v195_v51  ;;  %v3330_v34 = vsub.s32 1, %v3324_v7 }
  0xf4   :  { %2938 = vcosq.f32 %v198_v52 }
  0xf5   :  { %2940 = vsinq.f32 %v198_v52  ;;  %v240_v11 = vrot.slane %v231_v9, %v3330_v34  ;;  %v2893_v9 = vld [vmem:[#allocation9 + $0xb0] sm:$0xff]  }
 0x101   :  { %v2939_v57 = vpop.eup %2938 }
 0x102   :  { %v2941_v58 = vpop.eup %2940  ;;  %v210_v59 = vxor.u32 2147483648, %v2939_v57 }
 0x103   :  { %v207_v60 = vxor.u32 2147483648, %v2941_v58 }
 0x104   :  { %v211_v61 = vsel %vm209_vm9, %v210_v59, %v2941_v58 }
 0x105   :  { %v208_v62 = vsel %vm206_vm10, %v2939_v57, %v207_v60 }
 0x106   :  { %v212_v39 = vsel %vm205_vm11, %v208_v62, %v211_v61 }
 0x107   :  { %v213_v63 = vsel %vm202_vm12, nan, %v212_v39  ;;  %v2889_v39 = vld [vmem:[#allocation9 + $0xf8] sm:$0xff]  }
 0x108   :  { %v214_v1 = vpack.c.bf16 %v213_v63, %v213_v63  ;;  %v2890_v63 = vld [vmem:[#allocation9 + $0xb8] sm:$0xff]   ;;  %2694 = vmatprep.subr.bf16.mxu1 %v2889_v39 }
 0x10a   :  { %356 = vmatmul.mubr.bf16.vlgmr.msra.gmra.mxu0 %v214_v1  ;;  %v2891_v1 = vld [vmem:[#allocation9 + $0xf0] sm:$0xff]  }
 0x10b   :  { %2757 = vmatpush3.bf16.msra.mxu0 %v2881_v28  ;;  %2772 = vmatprep.mubr.msk.bf16.mxu0 %vm3242_vm14, %v3241_v29  ;;  %v2905_v28 = vld [vmem:[#allocation9 + $0x98] sm:$0xff]  }
 0x10c   :  { %2758 = vmatprep.subr.bf16.mxu0 %v3241_v29 }
 0x10f   :  { %2759 = vmatpush3.bf16.msra.mxu0 %v2882_v36 }
 0x110   :  { %2760 = vmatprep.subr.bf16.mxu0 %v3241_v29 }
 0x113   :  { %2761 = vmatpush3.bf16.msra.mxu0 %v2883_v37  ;;  %v2909_v37 = vld [vmem:[#allocation9 + $0x90] sm:$0xff]  }
 0x114   :  { %2762 = vmatprep.subr.bf16.mxu0 %v3241_v29 }
 0x117   :  { %2763 = vmatpush3.bf16.msra.mxu0 %v2884_v38  ;;  %v2911_v38 = vld [vmem:[#allocation9 + $0xc8] sm:$0xff]  }
 0x118   :  { %2764 = vmatprep.subr.bf16.mxu0 %v3241_v29 }
 0x11b   :  { %2765 = vmatpush3.bf16.msra.mxu0 %v2885_v40  ;;  %v2914_v40 = vld [vmem:[#allocation9 + $0x110] sm:$0xff]  }
 0x11c   :  { %2766 = vmatprep.subr.bf16.mxu0 %v3241_v29 }
 0x11f   :  { %2767 = vmatpush3.bf16.msra.mxu0 %v2886_v41  ;;  %v2916_v41 = vld [vmem:[#allocation9 + $0x148] sm:$0xff]  }
 0x120   :  { %2768 = vmatprep.subr.bf16.mxu0 %v3241_v29 }
 0x123   :  { %2769 = vmatpush3.bf16.msra.mxu0 %v2887_v42  ;;  %v2913_v42 = vld [vmem:[#allocation9 + $0x88] sm:$0xff]  }
 0x124   :  { %2770 = vmatprep.subr.bf16.mxu0 %v3241_v29 }
 0x127   :  { %2771 = vmatpush3.bf16.msra.mxu0 %v2888_v43  ;;  %v2915_v43 = vld [vmem:[#allocation9 + $0xc0] sm:$0xff]  }
 0x128   :  { %2716 = vmatprep.subr.bf16.mxu0 %v2892_v2 }
 0x1ca   :  { %v357_v12 = vpop.f32.mrf.mxu0 }
 0x1cb   :  { %v358_v13 = vadd.f32 %v357_v12, %v236_v10  ;;  %v739_v10 = vunpack.c.0.s8 %v738_v5  ;;  %v2898_v12 = vld [vmem:[#allocation9 + $0x130] sm:$0xff]  }
 0x1cc   :  { %v359_v14 = vpop.f32.mrf.mxu0 }
 0x1cd   :  { %v360_v15 = vadd.f32 %v359_v14, %v240_v11  ;;  %v364_v18 = vpack.c.bf16 %v358_v13, %v358_v13  ;;  %v2895_v11 = vld [vmem:[#allocation9 + $0xe8] sm:$0xff]  }
 0x1ce   :  { %v361_v16 = vpop.f32.mrf.mxu0  ;;  %v2900_v13 = vld [vmem:[#allocation9 + $0x168] sm:$0xff]  }
 0x1cf   :  { %v365_v17 = vpack.c.bf16 %v360_v15, %v360_v15  ;;  %v2897_v14 = vld [vmem:[#allocation9 + $0xa8] sm:$0xff]   ;;  %v3351_v15 = vsub.s32 %v739_v10, %v3324_v7  ;;  %v2899_v16 = vld [vmem:[#allocation9 + $0xe0] sm:$0xff]  }
 0x1d0   :  { %v362_v19 = vpop.f32.mrf.mxu0 }
 0x1d1   :  { %533 = vmatprep.mubr.bf16.mxu1 %v365_v17  ;;  %v2902_v17 = vld [vmem:[#allocation9 + $0x128] sm:$0xff]   ;;  %v734_v19 = vld [vmem:[%s3450_s1] sm:$0xff]  ;;  %s3244_s1 = smov [#allocation2]  }
 0x1d2   :  { %534 = vmatmul.mubr.bf16.vlgmr.msra.gmra.mxu1 %v364_v18  ;;  %v2904_v18 = vld [vmem:[#allocation9 + $0x160] sm:$0xff]   ;;  %s84_s24 = sshll.u32 %s3244_s1, 4  ;;  %s85_s24 = int_to_ptr.vmem [resolvable:$true] %s84_s24 }
 0x1d3   :  { %2695 = vmatpush3.bf16.msra.mxu1 %v2890_v63  ;;  %s3184_s25 = scalar_lea.vmem %s85_s24, 12288  ;;  %p3189_p7 = scmp.lt.s32.totalorder %s85_s24, %s85_s24 }
 0x1d4   :  { %2696 = vmatprep.subr.bf16.mxu1 %v2891_v1  ;;  %p3185_p6 = scmp.ne.s32.totalorder %s85_s24, %s3184_s25  ;;  %p3190_p8 = scmp.lt.s32.totalorder %s3184_s25, %s3184_s25 }
 0x1d6   :  { %p3191_p9 = por %p3190_p8, %p3189_p7 }
 0x1d7   :  { %2697 = vmatpush3.bf16.msra.mxu1 %v2893_v9 }
 0x1d8   :  { %2698 = vmatprep.subr.bf16.mxu1 %v2895_v11  ;;  %p3192_p10 = pnand %p3191_p9, %p3185_p6 }
 0x1db   :  { %2699 = vmatpush3.bf16.msra.mxu1 %v2897_v14 }
 0x1dc   :  { %2700 = vmatprep.subr.bf16.mxu1 %v2899_v16 }
 0x292   :  { %v2679_v20 = vpop.f32.mrf.mxu1 }
 0x294   :  { %v2680_v21 = vpop.f32.mrf.mxu1 }
 0x295   :  { %v2681_v23 = vadd.f32 %v2680_v21, %v2679_v20  ;;  %v2901_v20 = vld [vmem:[#allocation9 + $0xa0] sm:$0xff]   ;;  %v743_v21 = vrot.slane %v734_v19, %v3351_v15 }
 0x296   :  { %v2682_v24 = vpop.f32.mrf.mxu1  ;;  %2701 = vmatpush3.bf16.msra.mxu1 %v2901_v20 }
 0x297   :  { %v536_v25 = vadd.f32 %v2681_v23, %v2479_v22  ;;  %v736_v22 = vcombine.high %v734_v19, %v734_v19  ;;  %v2903_v23 = vld [vmem:[#allocation9 + $0xd8] sm:$0xff]   ;;  %v2906_v24 = vld [vmem:[#allocation9 + $0x120] sm:$0xff]   ;;  %v2508_v19 = vld [vmem:[#allocation10 + $0x9] ss:$0 sm:$0xff] }
 0x298   :  { %v2683_v26 = vpop.f32.mrf.mxu1  ;;  %2702 = vmatprep.subr.bf16.mxu1 %v2903_v23 }
 0x299   :  { %v542_v27 = vsel %vm541_vm13, %v536_v25, 0.0  ;;  %v751_v26 = vcombine.high %v743_v21, %v743_v21 }
 0x29a   :  { %543 = vadd.xlane.f32.xlu0 %v542_v27  ;;  %v750_v27 = vrot.slane %v736_v22, %v3351_v15  ;;  %2703 = vmatpush3.bf16.msra.mxu1 %v2905_v28 }
 0x323   :  { %v544_v30 = vpop.xlane.xlu0 %543 }
 0x324   :  { %v546_v31 = vmul.f32 0.0078125, %v544_v30  ;;  %v758_v30 = vpack.c.bf16 %v751_v26, %v751_v26  ;;  %v2549_v26 = vld [vmem:[#allocation10 + $0xa] ss:$0 sm:$0xff] }
 0x326   :  { %v547_v32 = vsub.f32 %v536_v25, %v546_v31  ;;  %v2908_v25 = vld [vmem:[#allocation9 + $0x158] sm:$0xff]   ;;  %v752_v31 = vcombine.high %v750_v27, %v750_v27  ;;  %1049 = vmatprep.mubr.bf16.mxu1 %v758_v30 }
 0x328   :  { %v548_v33 = vmul.f32 %v547_v32, %v547_v32  ;;  %v760_v36 = vpack.c.bf16 %v752_v31, %v752_v31 }
 0x32a   :  { %v549_v35 = vsel %vm541_vm13, %v548_v33, 0.0  ;;  %v2910_v33 = vld [vmem:[#allocation9 + $0x118] sm:$0xff]  }
 0x32b   :  { %550 = vadd.xlane.f32.xlu1 %v549_v35  ;;  %v2912_v35 = vld [vmem:[#allocation9 + $0x150] sm:$0xff]  }
 0x3b4   :  { %v551_v44 = vpop.xlane.xlu1 %550 }
 0x3b5   :  { %v552_v45 = vmul.f32 0.0078125, %v551_v44  ;;  %v2918_v44 = vld [vmem:[#allocation9 + $0x108] sm:$0xff]  }
 0x3b7   :  { %v553_v46 = vadd.f32 1e-05, %v552_v45  ;;  %v2919_v45 = vld [vmem:[#allocation9 + $0x140] sm:$0xff]  }
 0x3b9   :  { %2942 = vrsqrt.f32 %v553_v46  ;;  %v2917_v46 = vld [vmem:[#allocation9 + $0x80] sm:$0xff]  }
 0x3c6   :  { %v2943_v47 = vpop.eup %2942 }
 0x3c7   :  { %v555_v49 = vmul.f32 %v2943_v47, %v547_v32  ;;  %v2907_v32 = vld [vmem:[#allocation9 + $0xd0] sm:$0xff]   ;;  %v2920_v47 = vld [vmem:[#allocation9 + $0x100] sm:$0xff]  }
 0x3c8   :  { %2704 = vmatprep.subr.bf16.mxu1 %v2907_v32 }
 0x3c9   :  { %v563_v51 = vmul.f32 %v2496_v48, %v555_v49  ;;  %2705 = vmatpush3.bf16.msra.mxu1 %v2909_v37  ;;  %v757_v48 = vpack.c.bf16 %v743_v21, %v743_v21  ;;  %v759_v49 = vpack.c.bf16 %v750_v27, %v750_v27 }
 0x3ca   :  { %2706 = vmatprep.subr.bf16.mxu1 %v2911_v38 }
 0x3cb   :  { %v571_v52 = vadd.f32 %v2497_v50, %v563_v51  ;;  %v2922_v50 = vld [vmem:[#allocation7 + $0x124] ss:$20 sps:$4 sm:$0xff]  }
 0x3cd   :  { %v572_v53 = vmul.f32 0.01, %v571_v52  ;;  %2707 = vmatpush3.bf16.msra.mxu1 %v2913_v42  ;;  %v2931_v42 = vld [vmem:[#allocation7 + $0x100] ss:$20 sps:$4 sm:$0xff]  }
 0x3ce   :  { %2708 = vmatprep.subr.bf16.mxu1 %v2915_v43  ;;  %v2932_v43 = vld [vmem:[#allocation7 + $0xd8] ss:$20 sps:$4 sm:$0xff]  }
 0x3cf   :  { %v573_v54 = vmax.f32 %v571_v52, %v572_v53 }
 0x3d1   :  { %v574_v55 = vpack.c.bf16 %v573_v54, %v573_v54  ;;  %2709 = vmatpush3.bf16.msra.mxu1 %v2917_v46  ;;  %v2935_v46 = vld [vmem:[#allocation7 + $0x60] ss:$20 sps:$4 sm:$0xff]  }
 0x3d2   :  { %2776 = vmatprep.subr.bf16.mxu1 %v3241_v29 }
 0x3d3   :  { %2773 = vmatmul.mubr.bf16.vlgmr.msra.gmra.mxu0 %v574_v55 }
 0x3d4   :  { %2717 = vmatpush3.bf16.msra.mxu0 %v2894_v3  ;;  %1089 = vmatprep.mubr.bf16.mxu0 %v760_v36 }
 0x3d5   :  { %2718 = vmatprep.subr.bf16.mxu0 %v2896_v6  ;;  %1050 = vmatmul.mubr.bf16.vlgmr.msra.gmra.mxu1 %v757_v48  ;;  %v2937_v48 = vld [vmem:[#allocation7 + $0x10] ss:$20 sps:$4 sm:$0xff]  }
 0x3d6   :  { %2777 = vmatpush3.bf16.msra.mxu1 %v2922_v50  ;;  %2792 = vmatprep.mubr.msk.bf16.mxu1 %vm3242_vm14, %v3241_v29 }
 0x3d7   :  { %2778 = vmatprep.subr.bf16.mxu1 %v3241_v29 }
 0x3d8   :  { %2719 = vmatpush3.bf16.msra.mxu0 %v2898_v12 }
 0x3d9   :  { %2720 = vmatprep.subr.bf16.mxu0 %v2900_v13 }
 0x3dc   :  { %2721 = vmatpush3.bf16.msra.mxu0 %v2902_v17  ;;  %v2507_v17 = vld [vmem:[#allocation10 + $0x8] ss:$0 sm:$0xff] }
 0x3dd   :  { %2722 = vmatprep.subr.bf16.mxu0 %v2904_v18 }
 0x3e0   :  { %2723 = vmatpush3.bf16.msra.mxu0 %v2906_v24 }
 0x3e1   :  { %2724 = vmatprep.subr.bf16.mxu0 %v2908_v25 }
 0x3e4   :  { %2725 = vmatpush3.bf16.msra.mxu0 %v2910_v33 }
 0x3e5   :  { %2726 = vmatprep.subr.bf16.mxu0 %v2912_v35  ;;  %v2930_v35 = vld [vmem:[#allocation7 + $0x128] ss:$20 sps:$4 sm:$0xff]  }
 0x3e8   :  { %2727 = vmatpush3.bf16.msra.mxu0 %v2914_v40 }
 0x3e9   :  { %2728 = vmatprep.subr.bf16.mxu0 %v2916_v41 }
 0x3ec   :  { %2729 = vmatpush3.bf16.msra.mxu0 %v2918_v44  ;;  %v2933_v44 = vld [vmem:[#allocation7 + $0xb0] ss:$20 sps:$4 sm:$0xff]  }
 0x3ed   :  { %2730 = vmatprep.subr.bf16.mxu0 %v2919_v45  ;;  %v2934_v45 = vld [vmem:[#allocation7 + $0x88] ss:$20 sps:$4 sm:$0xff]  }
 0x3f0   :  { %2731 = vmatpush3.bf16.msra.mxu0 %v2920_v47  ;;  %v2936_v47 = vld [vmem:[#allocation7 + $0x38] ss:$20 sps:$4 sm:$0xff]  }
 0x3f1   :  { %2796 = vmatprep.subr.bf16.mxu0 %v3241_v29 }
 0x3f3   :  { %1090 = vmatmul.mubr.bf16.vlgmr.msra.gmra.mxu0 %v759_v49 }
 0x3f4   :  { %2812 = vmatprep.mubr.msk.bf16.mxu0 %vm3242_vm14, %v3241_v29  ;;  %2797 = vmatpush3.bf16.msra.mxu0 %v2930_v35 }
 0x3f5   :  { %2798 = vmatprep.subr.bf16.mxu0 %v3241_v29 }
 0x3f8   :  { %2799 = vmatpush3.bf16.msra.mxu0 %v2931_v42 }
 0x3f9   :  { %2800 = vmatprep.subr.bf16.mxu0 %v3241_v29 }
 0x3fc   :  { %2801 = vmatpush3.bf16.msra.mxu0 %v2932_v43 }
 0x3fd   :  { %2802 = vmatprep.subr.bf16.mxu0 %v3241_v29 }
 0x400   :  { %2803 = vmatpush3.bf16.msra.mxu0 %v2933_v44 }
 0x401   :  { %2804 = vmatprep.subr.bf16.mxu0 %v3241_v29 }
 0x404   :  { %2805 = vmatpush3.bf16.msra.mxu0 %v2934_v45 }
 0x405   :  { %2806 = vmatprep.subr.bf16.mxu0 %v3241_v29 }
 0x408   :  { %2807 = vmatpush3.bf16.msra.mxu0 %v2935_v46 }
 0x409   :  { %2808 = vmatprep.subr.bf16.mxu0 %v3241_v29 }
 0x40c   :  { %2809 = vmatpush3.bf16.msra.mxu0 %v2936_v47 }
 0x40d   :  { %2810 = vmatprep.subr.bf16.mxu0 %v3241_v29 }
 0x410   :  { %2811 = vmatpush3.bf16.msra.mxu0 %v2937_v48 }
 0x493   :  { %v680_v57 = vpop.f32.mrf.mxu0 }
 0x494   :  { %v3346_v58 = vadd.f32 %v2498_v56, %v680_v57  ;;  %v2923_v56 = vld [vmem:[#allocation7 + $0xfc] ss:$20 sps:$4 sm:$0xff]   ;;  %v2924_v57 = vld [vmem:[#allocation7 + $0xd4] ss:$20 sps:$4 sm:$0xff]  }
 0x495   :  { %v2774_v59 = vpop.f32.mrf.mxu0  ;;  %2779 = vmatpush3.bf16.msra.mxu1 %v2923_v56  ;;  %v2710_v39 = vpop.f32.mrf.mxu1 }
 0x496   :  { %v686_v60 = vsel %vm541_vm13, %v3346_v58, 0.0  ;;  %2780 = vmatprep.subr.bf16.mxu1 %v3241_v29  ;;  %v2925_v59 = vld [vmem:[#allocation7 + $0xac] ss:$20 sps:$4 sm:$0xff]  }
 0x497   :  { %687 = vadd.xlane.f32.xlu1 %v686_v60  ;;  %v683_v61 = vpop.f32.mrf.mxu0  ;;  %v2926_v60 = vld [vmem:[#allocation7 + $0x84] ss:$20 sps:$4 sm:$0xff]   ;;  %v2711_v1 = vpop.f32.mrf.mxu1 }
 0x498   :  { %v2927_v61 = vld [vmem:[#allocation7 + $0x5c] ss:$20 sps:$4 sm:$0xff]   ;;  %v2712_v2 = vadd.f32 %v2711_v1, %v2710_v39 }
 0x499   :  { %v2775_v62 = vpop.f32.mrf.mxu0  ;;  %2781 = vmatpush3.bf16.msra.mxu1 %v2924_v57  ;;  %v2713_v4 = vpop.f32.mrf.mxu1 }
 0x49a   :  { %2782 = vmatprep.subr.bf16.mxu1 %v3241_v29  ;;  %v2929_v62 = vld [vmem:[#allocation7 + $0xc] ss:$20 sps:$4 sm:$0xff]  }
 0x49b   :  { %v2714_v9 = vpop.f32.mrf.mxu1 }
 0x49d   :  { %2783 = vmatpush3.bf16.msra.mxu1 %v2925_v59 }
 0x49e   :  { %2784 = vmatprep.subr.bf16.mxu1 %v3241_v29 }
 0x4a1   :  { %2785 = vmatpush3.bf16.msra.mxu1 %v2926_v60 }
 0x4a2   :  { %2786 = vmatprep.subr.bf16.mxu1 %v3241_v29 }
 0x4a5   :  { %2787 = vmatpush3.bf16.msra.mxu1 %v2927_v61 }
 0x4a6   :  { %2788 = vmatprep.subr.bf16.mxu1 %v3241_v29 }
 0x4b3   :  { %v2732_v63 = vpop.f32.mrf.mxu0 }
 0x4b5   :  { %v2733_v3 = vpop.f32.mrf.mxu0 }
 0x4b6   :  { %v2734_v5 = vadd.f32 %v2733_v3, %v2732_v63 }
 0x4b7   :  { %v2735_v6 = vpop.f32.mrf.mxu0 }
 0x4b8   :  { %v1092_v10 = vadd.f32 %v2734_v5, %v2712_v2 }
 0x4b9   :  { %v2736_v11 = vpop.f32.mrf.mxu0 }
 0x520   :  { %v688_v51 = vpop.xlane.xlu1 %687 }
 0x521   :  { %v689_v52 = vmul.f32 0.0078125, %v688_v51 }
 0x523   :  { %v690_v53 = vsub.f32 %v3346_v58, %v689_v52  ;;  %v2928_v58 = vld [vmem:[#allocation7 + $0x34] ss:$20 sps:$4 sm:$0xff]  }
 0x524   :  { %2789 = vmatpush3.bf16.msra.mxu1 %v2928_v58  ;;  %v2552_v58 = vld [vmem:[#allocation10 + $0xd] ss:$0 sm:$0xff] }
 0x525   :  { %v691_v54 = vmul.f32 %v690_v53, %v690_v53  ;;  %2790 = vmatprep.subr.bf16.mxu1 %v3241_v29 }
 0x527   :  { %v692_v55 = vsel %vm541_vm13, %v691_v54, 0.0 }
 0x528   :  { %693 = vadd.xlane.f32.xlu1 %v692_v55  ;;  %2791 = vmatpush3.bf16.msra.mxu1 %v2929_v62  ;;  %v2551_v55 = vld [vmem:[#allocation10 + $0xc] ss:$0 sm:$0xff] }
 0x5b1   :  { %v694_v12 = vpop.xlane.xlu1 %693 }
 0x5b2   :  { %v695_v13 = vmul.f32 0.0078125, %v694_v12 }
 0x5b4   :  { %v696_v14 = vadd.f32 1e-05, %v695_v13 }
 0x5b6   :  { %2944 = vrsqrt.f32 %v696_v14 }
 0x5c3   :  { %v2945_v16 = vpop.eup %2944 }
 0x5c4   :  { %v698_v18 = vmul.f32 %v2945_v16, %v690_v53  ;;  %v2550_v53 = vld [vmem:[#allocation10 + $0xb] ss:$0 sm:$0xff] }
 0x5c6   :  { %v706_v20 = vmul.f32 %v2507_v17, %v698_v18 }
 0x5c8   :  { %v714_v21 = vadd.f32 %v2508_v19, %v706_v20 }
 0x5ca   :  { %v715_v22 = vmul.f32 0.01, %v714_v21 }
 0x5cc   :  { %v716_v23 = vmax.f32 %v714_v21, %v715_v22 }
 0x5ce   :  { %v3373_v24 = vpack.c.bf16 %v716_v23, %v716_v23 }
 0x5d0   :  { %2793 = vmatmul.mubr.bf16.vlgmr.msra.gmra.mxu1 %v3373_v24 }
 0x690   :  { %v1179_v25 = vpop.f32.mrf.mxu1 }
 0x691   :  { %v1180_v27 = vadd.f32 %v1179_v25, %v1092_v10 }
 0x692   :  { %v2794_v28 = vpop.f32.mrf.mxu1 }
 0x693   :  { %v1192_v30 = vadd.f32 %v2549_v26, %v1180_v27 }
 0x694   :  { %v1182_v31 = vpop.f32.mrf.mxu1 }
 0x695   :  { %v1193_v32 = vsel %vm541_vm13, %v1192_v30, 0.0 }
 0x696   :  { %v2795_v33 = vpop.f32.mrf.mxu1  ;;  %1194 = vadd.xlane.f32.xlu1 %v1193_v32 }
 0x71f   :  { %v1195_v36 = vpop.xlane.xlu1 %1194 }
 0x720   :  { %v1196_v37 = vmul.f32 0.0078125, %v1195_v36 }
 0x722   :  { %v1197_v38 = vsub.f32 %v1192_v30, %v1196_v37 }
 0x724   :  { %v1198_v40 = vmul.f32 %v1197_v38, %v1197_v38 }
 0x726   :  { %v1199_v41 = vsel %vm541_vm13, %v1198_v40, 0.0 }
 0x727   :  { %1200 = vadd.xlane.f32.xlu1 %v1199_v41 }
 0x7b0   :  { %v1201_v49 = vpop.xlane.xlu1 %1200 }
 0x7b1   :  { %v1202_v50 = vmul.f32 0.0078125, %v1201_v49 }
 0x7b3   :  { %v1203_v51 = vadd.f32 1e-05, %v1202_v50 }
 0x7b5   :  { %2946 = vrsqrt.f32 %v1203_v51 }
 0x7c2   :  { %v2947_v52 = vpop.eup %2946 }
 0x7c3   :  { %v1205_v54 = vmul.f32 %v2947_v52, %v1197_v38 }
 0x7c5   :  { %v1213_v56 = vmul.f32 %v2550_v53, %v1205_v54 }
 0x7c7   :  { %v1221_v57 = vadd.f32 %v2551_v55, %v1213_v56 }
 0x7c9   :  { %v1222_v59 = vmul.f32 0.01, %v1221_v57 }
 0x7cb   :  { %v1223_v60 = vmax.f32 %v1221_v57, %v1222_v59 }
 0x7cd   :  { %v1224_v61 = vpack.c.bf16 %v1223_v60, %v1223_v60 }
 0x7cf   :  { %2813 = vmatmul.mubr.bf16.vlgmr.msra.gmra.mxu0 %v1224_v61 }
 0x88f   :  { %v1330_v62 = vpop.f32.mrf.mxu0 }
 0x890   :  { %v1331_v39 = vadd.f32 %v2552_v58, %v1330_v62 }
 0x891   :  { %v2814_v63 = vpop.f32.mrf.mxu0 }
 0x892   :  { %v1336_v29 = vsel %vm541_vm13, %v1331_v39, 0.0 }
 0x893   :  { %1337 = vadd.xlane.f32.xlu1 %v1336_v29  ;;  %v1333_v1 = vpop.f32.mrf.mxu0 }
 0x895   :  { %v2815_v2 = vpop.f32.mrf.mxu0 }
 0x91c   :  { %v1338_v3 = vpop.xlane.xlu1 %1337 }
 0x91d   :  { %v1339_v4 = vmul.f32 0.0078125, %v1338_v3 }
 0x91f   :  { %v1340_v5 = vsub.f32 %v1331_v39, %v1339_v4 }
 0x921   :  { %v1341_v6 = vmul.f32 %v1340_v5, %v1340_v5 }
 0x923   :  { %v1342_v9 = vsel %vm541_vm13, %v1341_v6, 0.0 }
 0x924   :  { %1343 = vadd.xlane.f32.xlu1 %v1342_v9 }
 0x925   :  { %3195 = shalt.err (!%p3192_p10)  }
 0x926   :  { %87 = dma.hbm_to_vmem [thread:$0]  %s3455_s6, 12288, %s85_s24, [#allocation3]  ;;  %v2561_v14 = vld [vmem:[#allocation10 + $0xe] ss:$0 sm:$0xff]  ;;  %v2562_v17 = vld [vmem:[#allocation10 + $0xf] ss:$0 sm:$0xff] }
 0x9ad   :  { %v1344_v10 = vpop.xlane.xlu1 %1343 }
 0x9ae   :  { %v1345_v11 = vmul.f32 0.0078125, %v1344_v10 }
 0x9b0   :  { %v1346_v12 = vadd.f32 1e-05, %v1345_v11 }
 0x9b2   :  { %2948 = vrsqrt.f32 %v1346_v12 }
 0x9bf   :  { %v2949_v13 = vpop.eup %2948 }
 0x9c0   :  { %v1348_v16 = vmul.f32 %v2949_v13, %v1340_v5 }
 0x9c2   :  { %v1356_v18 = vmul.f32 %v2561_v14, %v1348_v16 }
 0x9c4   :  { %v1364_v19 = vadd.f32 %v2562_v17, %v1356_v18 }
 0x9c6   :  { %v1365_v20 = vmul.f32 0.01, %v1364_v19 }
 0x9c8   :  { %v1366_v21 = vmax.f32 %v1364_v19, %v1365_v20 }
 0x9ca   :  { %v3390_v22 = vpack.c.bf16 %v1366_v21, %v1366_v21 }
 0x9cb   :  { %3222 = dma.done.wait [#allocation3], 12288 }
 0x9cc   :  { %3223 = vsyncadd [#allocation3], 4294955008  ;;  %1724 = vmatprep.mubr.bf16.mxu1 %v3234_v0  ;;  %1765 = vmatprep.mubr.bf16.mxu0 %v3234_v0  ;;  %v2950_v23 = vld [vmem:[#allocation2 + $0x2a4] ss:$48 sps:$4 sm:$0xff]   ;;  %v2952_v25 = vld [vmem:[#allocation2 + $0x2ac] ss:$48 sps:$4 sm:$0xff]  }
 0x9cd   :  { %1692 = vmatprep.subr.bf16.mxu1 %v2950_v23  ;;  %v2954_v26 = vld [vmem:[#allocation2 + $0x2a0] ss:$48 sps:$4 sm:$0xff]   ;;  %v2955_v27 = vld [vmem:[#allocation2 + $0x2a8] ss:$48 sps:$4 sm:$0xff]   ;;  %1733 = vmatprep.subr.bf16.mxu0 %v2952_v25  ;;  %v2956_v28 = vld [vmem:[#allocation2 + $0x244] ss:$48 sps:$4 sm:$0xff]  }
 0x9ce   :  { %1693 = vmatpush1.bf16.msra.mxu1 %v2954_v26  ;;  %1734 = vmatpush1.bf16.msra.mxu0 %v2955_v27  ;;  %v2958_v30 = vld [vmem:[#allocation2 + $0x24c] ss:$48 sps:$4 sm:$0xff]   ;;  %v2960_v31 = vld [vmem:[#allocation2 + $0x240] ss:$48 sps:$4 sm:$0xff]   ;;  %v2961_v32 = vld [vmem:[#allocation2 + $0x248] ss:$48 sps:$4 sm:$0xff]  }
 0x9cf   :  { %1694 = vmatprep.subr.bf16.mxu1 %v2956_v28  ;;  %1735 = vmatprep.subr.bf16.mxu0 %v2958_v30  ;;  %v2962_v33 = vld [vmem:[#allocation2 + $0x1e4] ss:$48 sps:$4 sm:$0xff]   ;;  %v2964_v35 = vld [vmem:[#allocation2 + $0x1ec] ss:$48 sps:$4 sm:$0xff]   ;;  %v2966_v36 = vld [vmem:[#allocation2 + $0x1e0] ss:$48 sps:$4 sm:$0xff]  }
 0x9d0   :  { %v2967_v37 = vld [vmem:[#allocation2 + $0x1e8] ss:$48 sps:$4 sm:$0xff]   ;;  %v2968_v38 = vld [vmem:[#allocation2 + $0x184] ss:$48 sps:$4 sm:$0xff]   ;;  %v2970_v40 = vld [vmem:[#allocation2 + $0x18c] ss:$48 sps:$4 sm:$0xff]  }
 0x9d1   :  { %v2972_v41 = vld [vmem:[#allocation2 + $0x180] ss:$48 sps:$4 sm:$0xff]   ;;  %v2973_v42 = vld [vmem:[#allocation2 + $0x188] ss:$48 sps:$4 sm:$0xff]   ;;  %v2974_v43 = vld [vmem:[#allocation2 + $0x124] ss:$48 sps:$4 sm:$0xff]  }
 0x9d2   :  { %1695 = vmatpush1.bf16.msra.mxu1 %v2960_v31  ;;  %1736 = vmatpush1.bf16.msra.mxu0 %v2961_v32  ;;  %v2976_v44 = vld [vmem:[#allocation2 + $0x12c] ss:$48 sps:$4 sm:$0xff]   ;;  %v2978_v45 = vld [vmem:[#allocation2 + $0x120] ss:$48 sps:$4 sm:$0xff]   ;;  %v2979_v46 = vld [vmem:[#allocation2 + $0x128] ss:$48 sps:$4 sm:$0xff]  }
 0x9d3   :  { %1696 = vmatprep.subr.bf16.mxu1 %v2962_v33  ;;  %1737 = vmatprep.subr.bf16.mxu0 %v2964_v35  ;;  %v2980_v47 = vld [vmem:[#allocation2 + $0xc4] ss:$48 sps:$4 sm:$0xff]   ;;  %v2982_v48 = vld [vmem:[#allocation2 + $0xcc] ss:$48 sps:$4 sm:$0xff]   ;;  %v2984_v49 = vld [vmem:[#allocation2 + $0xc0] ss:$48 sps:$4 sm:$0xff]  }
 0x9d4   :  { %v2985_v50 = vld [vmem:[#allocation2 + $0xc8] ss:$48 sps:$4 sm:$0xff]   ;;  %v2986_v51 = vld [vmem:[#allocation2 + $0x64] ss:$48 sps:$4 sm:$0xff]   ;;  %v2988_v52 = vld [vmem:[#allocation2 + $0x6c] ss:$48 sps:$4 sm:$0xff]  }
 0x9d5   :  { %v2990_v53 = vld [vmem:[#allocation2 + $0x60] ss:$48 sps:$4 sm:$0xff]   ;;  %v2991_v54 = vld [vmem:[#allocation2 + $0x68] ss:$48 sps:$4 sm:$0xff]   ;;  %v2992_v55 = vld [vmem:[#allocation2 + $0x4] ss:$48 sps:$4 sm:$0xff]  }
 0x9d6   :  { %1697 = vmatpush1.bf16.msra.mxu1 %v2966_v36  ;;  %1738 = vmatpush1.bf16.msra.mxu0 %v2967_v37  ;;  %v2994_v56 = vld [vmem:[#allocation2 + $0xc] ss:$48 sps:$4 sm:$0xff]   ;;  %v2996_v57 = vld [vmem:[#allocation2] ss:$48 sps:$4 sm:$0xff]   ;;  %v2997_v59 = vld [vmem:[#allocation2 + $0x8] ss:$48 sps:$4 sm:$0xff]  }
 0x9d7   :  { %1698 = vmatprep.subr.bf16.mxu1 %v2968_v38  ;;  %1739 = vmatprep.subr.bf16.mxu0 %v2970_v40  ;;  %v3000_v60 = vld [vmem:[#allocation2 + $0x2b4] ss:$48 sps:$4 sm:$0xff]   ;;  %v3003_v61 = vld [vmem:[#allocation2 + $0x2bc] ss:$48 sps:$4 sm:$0xff]   ;;  %v2998_v58 = vld [vmem:[#allocation2 + $0x2b0] ss:$48 sps:$4 sm:$0xff]  }
 0x9d8   :  { %v3001_v62 = vld [vmem:[#allocation2 + $0x2b8] ss:$48 sps:$4 sm:$0xff]   ;;  %v3006_v39 = vld [vmem:[#allocation2 + $0x254] ss:$48 sps:$4 sm:$0xff]   ;;  %v3009_v63 = vld [vmem:[#allocation2 + $0x25c] ss:$48 sps:$4 sm:$0xff]  }
 0x9d9   :  { %v3004_v29 = vld [vmem:[#allocation2 + $0x250] ss:$48 sps:$4 sm:$0xff]   ;;  %v3007_v1 = vld [vmem:[#allocation2 + $0x258] ss:$48 sps:$4 sm:$0xff]   ;;  %v3012_v2 = vld [vmem:[#allocation2 + $0x1f4] ss:$48 sps:$4 sm:$0xff]  }
 0x9da   :  { %1699 = vmatpush1.bf16.msra.mxu1 %v2972_v41  ;;  %1740 = vmatpush1.bf16.msra.mxu0 %v2973_v42  ;;  %v3015_v3 = vld [vmem:[#allocation2 + $0x1fc] ss:$48 sps:$4 sm:$0xff]   ;;  %v3010_v4 = vld [vmem:[#allocation2 + $0x1f0] ss:$48 sps:$4 sm:$0xff]   ;;  %v3013_v5 = vld [vmem:[#allocation2 + $0x1f8] ss:$48 sps:$4 sm:$0xff]  }
 0x9db   :  { %1700 = vmatprep.subr.bf16.mxu1 %v2974_v43  ;;  %1741 = vmatprep.subr.bf16.mxu0 %v2976_v44  ;;  %v3018_v6 = vld [vmem:[#allocation2 + $0x194] ss:$48 sps:$4 sm:$0xff]   ;;  %v3021_v9 = vld [vmem:[#allocation2 + $0x19c] ss:$48 sps:$4 sm:$0xff]   ;;  %v3016_v10 = vld [vmem:[#allocation2 + $0x190] ss:$48 sps:$4 sm:$0xff]  }
 0x9dc   :  { %v3019_v11 = vld [vmem:[#allocation2 + $0x198] ss:$48 sps:$4 sm:$0xff]   ;;  %v3024_v12 = vld [vmem:[#allocation2 + $0x134] ss:$48 sps:$4 sm:$0xff]   ;;  %v3027_v13 = vld [vmem:[#allocation2 + $0x13c] ss:$48 sps:$4 sm:$0xff]  }
 0x9dd   :  { %v3022_v14 = vld [vmem:[#allocation2 + $0x130] ss:$48 sps:$4 sm:$0xff]   ;;  %v3025_v16 = vld [vmem:[#allocation2 + $0x138] ss:$48 sps:$4 sm:$0xff]   ;;  %v3030_v17 = vld [vmem:[#allocation2 + $0xd4] ss:$48 sps:$4 sm:$0xff]  }
 0x9de   :  { %1701 = vmatpush1.bf16.msra.mxu1 %v2978_v45  ;;  %1742 = vmatpush1.bf16.msra.mxu0 %v2979_v46  ;;  %v3033_v18 = vld [vmem:[#allocation2 + $0xdc] ss:$48 sps:$4 sm:$0xff]   ;;  %v3028_v19 = vld [vmem:[#allocation2 + $0xd0] ss:$48 sps:$4 sm:$0xff]   ;;  %v3031_v20 = vld [vmem:[#allocation2 + $0xd8] ss:$48 sps:$4 sm:$0xff]  }
 0x9df   :  { %1702 = vmatprep.subr.bf16.mxu1 %v2980_v47  ;;  %1743 = vmatprep.subr.bf16.mxu0 %v2982_v48  ;;  %v3036_v21 = vld [vmem:[#allocation2 + $0x74] ss:$48 sps:$4 sm:$0xff]   ;;  %v3039_v23 = vld [vmem:[#allocation2 + $0x7c] ss:$48 sps:$4 sm:$0xff]   ;;  %v3034_v25 = vld [vmem:[#allocation2 + $0x70] ss:$48 sps:$4 sm:$0xff]  }
 0x9e0   :  { %v3037_v26 = vld [vmem:[#allocation2 + $0x78] ss:$48 sps:$4 sm:$0xff]   ;;  %v3042_v27 = vld [vmem:[#allocation2 + $0x14] ss:$48 sps:$4 sm:$0xff]   ;;  %v3045_v28 = vld [vmem:[#allocation2 + $0x1c] ss:$48 sps:$4 sm:$0xff]  }
 0x9e1   :  { %v3040_v30 = vld [vmem:[#allocation2 + $0x10] ss:$48 sps:$4 sm:$0xff]   ;;  %v3043_v31 = vld [vmem:[#allocation2 + $0x18] ss:$48 sps:$4 sm:$0xff]   ;;  %v3048_v32 = vld [vmem:[#allocation2 + $0x2c4] ss:$48 sps:$4 sm:$0xff]  }
 0x9e2   :  { %1703 = vmatpush1.bf16.msra.mxu1 %v2984_v49  ;;  %1744 = vmatpush1.bf16.msra.mxu0 %v2985_v50  ;;  %v3051_v33 = vld [vmem:[#allocation2 + $0x2cc] ss:$48 sps:$4 sm:$0xff]   ;;  %v3046_v35 = vld [vmem:[#allocation2 + $0x2c0] ss:$48 sps:$4 sm:$0xff]   ;;  %v3049_v36 = vld [vmem:[#allocation2 + $0x2c8] ss:$48 sps:$4 sm:$0xff]  }
 0x9e3   :  { %1704 = vmatprep.subr.bf16.mxu1 %v2986_v51  ;;  %1745 = vmatprep.subr.bf16.mxu0 %v2988_v52  ;;  %v3054_v37 = vld [vmem:[#allocation2 + $0x264] ss:$48 sps:$4 sm:$0xff]   ;;  %v3057_v38 = vld [vmem:[#allocation2 + $0x26c] ss:$48 sps:$4 sm:$0xff]   ;;  %v3052_v40 = vld [vmem:[#allocation2 + $0x260] ss:$48 sps:$4 sm:$0xff]  }
 0x9e4   :  { %v3055_v41 = vld [vmem:[#allocation2 + $0x268] ss:$48 sps:$4 sm:$0xff]   ;;  %v3060_v42 = vld [vmem:[#allocation2 + $0x204] ss:$48 sps:$4 sm:$0xff]   ;;  %v3063_v43 = vld [vmem:[#allocation2 + $0x20c] ss:$48 sps:$4 sm:$0xff]  }
 0x9e5   :  { %v3058_v44 = vld [vmem:[#allocation2 + $0x200] ss:$48 sps:$4 sm:$0xff]   ;;  %v3061_v45 = vld [vmem:[#allocation2 + $0x208] ss:$48 sps:$4 sm:$0xff]   ;;  %v3069_v46 = vld [vmem:[#allocation2 + $0x1ac] ss:$48 sps:$4 sm:$0xff]  }
 0x9e6   :  { %1705 = vmatpush1.bf16.msra.mxu1 %v2990_v53  ;;  %1746 = vmatpush1.bf16.msra.mxu0 %v2991_v54  ;;  %v3064_v47 = vld [vmem:[#allocation2 + $0x1a0] ss:$48 sps:$4 sm:$0xff]   ;;  %v3067_v48 = vld [vmem:[#allocation2 + $0x1a8] ss:$48 sps:$4 sm:$0xff]   ;;  %v3072_v49 = vld [vmem:[#allocation2 + $0x144] ss:$48 sps:$4 sm:$0xff]  }
 0x9e7   :  { %1706 = vmatprep.subr.bf16.mxu1 %v2992_v55  ;;  %1747 = vmatprep.subr.bf16.mxu0 %v2994_v56  ;;  %v3075_v50 = vld [vmem:[#allocation2 + $0x14c] ss:$48 sps:$4 sm:$0xff]   ;;  %v3070_v51 = vld [vmem:[#allocation2 + $0x140] ss:$48 sps:$4 sm:$0xff]   ;;  %v3078_v52 = vld [vmem:[#allocation2 + $0xe4] ss:$48 sps:$4 sm:$0xff]  }
 0x9e8   :  { %v3081_v53 = vld [vmem:[#allocation2 + $0xec] ss:$48 sps:$4 sm:$0xff]   ;;  %v3076_v54 = vld [vmem:[#allocation2 + $0xe0] ss:$48 sps:$4 sm:$0xff]   ;;  %v3079_v55 = vld [vmem:[#allocation2 + $0xe8] ss:$48 sps:$4 sm:$0xff]  }
 0x9e9   :  { %v3084_v56 = vld [vmem:[#allocation2 + $0x84] ss:$48 sps:$4 sm:$0xff]   ;;  %s3245_s6 = smov [#allocation12]  }
 0x9ea   :  { %1707 = vmatpush1.bf16.msra.mxu1 %v2996_v57  ;;  %1748 = vmatpush1.bf16.msra.mxu0 %v2997_v59  ;;  %v3087_v57 = vld [vmem:[#allocation2 + $0x8c] ss:$48 sps:$4 sm:$0xff]   ;;  %v3082_v59 = vld [vmem:[#allocation2 + $0x80] ss:$48 sps:$4 sm:$0xff]   ;;  %s2440_s28 = sshll.u32 %s3245_s6, 4  ;;  %s2441_s28 = int_to_ptr.vmem [resolvable:$true] %s2440_s28 }
 0x9eb   :  { %1774 = vmatprep.subr.bf16.mxu1 %v3000_v60  ;;  %2170 = vmatprep.subr.bf16.mxu0 %v3003_v61  ;;  %v3085_v60 = vld [vmem:[#allocation2 + $0x88] ss:$48 sps:$4 sm:$0xff]   ;;  %v3090_v61 = vld [vmem:[#allocation2 + $0x24] ss:$48 sps:$4 sm:$0xff]   ;;  %s3196_s29 = scalar_lea.vmem %s2441_s28, 384  ;;  %p3201_p12 = scmp.lt.s32.totalorder %s2441_s28, %s2441_s28 }
 0x9ec   :  { %p3197_p11 = scmp.ne.s32.totalorder %s2441_s28, %s3196_s29  ;;  %p3202_p13 = scmp.lt.s32.totalorder %s3196_s29, %s3196_s29 }
 0x9ed   :  { %1725 = vmatmul.mubr.bf16.vlgmr.msra.gmra.mxu1 %v3390_v22  ;;  %1766 = vmatmul.mubr.bf16.vlgmr.msra.gmra.mxu0 %v3390_v22 }
 0x9ee   :  { %1775 = vmatpush1.bf16.msra.mxu1 %v2998_v58  ;;  %2171 = vmatpush1.bf16.msra.mxu0 %v3001_v62  ;;  %v3093_v58 = vld [vmem:[#allocation2 + $0x2c] ss:$48 sps:$4 sm:$0xff]   ;;  %v3088_v62 = vld [vmem:[#allocation2 + $0x20] ss:$48 sps:$4 sm:$0xff]   ;;  %p3203_p0 = por %p3202_p13, %p3201_p12 }
 0x9ef   :  { %1776 = vmatprep.subr.bf16.mxu1 %v3006_v39  ;;  %2172 = vmatprep.subr.bf16.mxu0 %v3009_v63  ;;  %v3091_v39 = vld [vmem:[#allocation2 + $0x28] ss:$48 sps:$4 sm:$0xff]   ;;  %v3405_v63 = vsub.s32 2, %v3324_v7 }
 0x9f0   :  { %1806 = vmatprep.mubr.bf16.mxu1 %v3234_v0  ;;  %2202 = vmatprep.mubr.bf16.mxu0 %v3234_v0  ;;  %p3204_p1 = pnand %p3203_p0, %p3197_p11 }
 0x9f2   :  { %1777 = vmatpush1.bf16.msra.mxu1 %v3004_v29  ;;  %2173 = vmatpush1.bf16.msra.mxu0 %v3007_v1  ;;  %v1420_v29 = vld [vmem:[#allocation10 + $0x10] sm:$0x3f]  ;;  %v3408_v1 = vsub.s32 3, %v3324_v7 }
 0x9f3   :  { %1778 = vmatprep.subr.bf16.mxu1 %v3012_v2  ;;  %2174 = vmatprep.subr.bf16.mxu0 %v3015_v3  ;;  %v1425_v2 = vrot.slane %v1420_v29, %v3327_v8  ;;  %v1433_v3 = vrot.slane %v1420_v29, %v3405_v63 }
 0x9f6   :  { %1779 = vmatpush1.bf16.msra.mxu1 %v3010_v4  ;;  %2175 = vmatpush1.bf16.msra.mxu0 %v3013_v5  ;;  %v1429_v4 = vrot.slane %v1420_v29, %v3330_v34  ;;  %v1437_v5 = vrot.slane %v1420_v29, %v3408_v1 }
 0x9f7   :  { %1780 = vmatprep.subr.bf16.mxu1 %v3018_v6  ;;  %2176 = vmatprep.subr.bf16.mxu0 %v3021_v9 }
 0x9fa   :  { %1781 = vmatpush1.bf16.msra.mxu1 %v3016_v10  ;;  %2177 = vmatpush1.bf16.msra.mxu0 %v3019_v11 }
 0x9fb   :  { %1782 = vmatprep.subr.bf16.mxu1 %v3024_v12  ;;  %2178 = vmatprep.subr.bf16.mxu0 %v3027_v13 }
 0x9fe   :  { %1783 = vmatpush1.bf16.msra.mxu1 %v3022_v14  ;;  %2179 = vmatpush1.bf16.msra.mxu0 %v3025_v16 }
 0x9ff   :  { %1784 = vmatprep.subr.bf16.mxu1 %v3030_v17  ;;  %2180 = vmatprep.subr.bf16.mxu0 %v3033_v18 }
 0xa02   :  { %1785 = vmatpush1.bf16.msra.mxu1 %v3028_v19  ;;  %2181 = vmatpush1.bf16.msra.mxu0 %v3031_v20 }
 0xa03   :  { %1786 = vmatprep.subr.bf16.mxu1 %v3036_v21  ;;  %2182 = vmatprep.subr.bf16.mxu0 %v3039_v23 }
 0xa06   :  { %1787 = vmatpush1.bf16.msra.mxu1 %v3034_v25  ;;  %2183 = vmatpush1.bf16.msra.mxu0 %v3037_v26 }
 0xa07   :  { %1788 = vmatprep.subr.bf16.mxu1 %v3042_v27  ;;  %2184 = vmatprep.subr.bf16.mxu0 %v3045_v28  ;;  %v3417_v27 = vsub.s32 4, %v3324_v7  ;;  %v3420_v28 = vsub.s32 5, %v3324_v7 }
 0xa0a   :  { %1789 = vmatpush1.bf16.msra.mxu1 %v3040_v30  ;;  %2185 = vmatpush1.bf16.msra.mxu0 %v3043_v31  ;;  %v1441_v30 = vrot.slane %v1420_v29, %v3417_v27  ;;  %v1445_v31 = vrot.slane %v1420_v29, %v3420_v28 }
 0xa0b   :  { %2211 = vmatprep.subr.bf16.mxu1 %v3048_v32  ;;  %2252 = vmatprep.subr.bf16.mxu0 %v3051_v33 }
 0xa0d   :  { %1807 = vmatmul.mubr.bf16.vlgmr.msra.gmra.mxu1 %v3390_v22  ;;  %2203 = vmatmul.mubr.bf16.vlgmr.msra.gmra.mxu0 %v3373_v24  ;;  %v3066_v22 = vld [vmem:[#allocation2 + $0x1a4] ss:$48 sps:$4 sm:$0xff]  }
 0xa0e   :  { %2212 = vmatpush1.bf16.msra.mxu1 %v3046_v35  ;;  %2253 = vmatpush1.bf16.msra.mxu0 %v3049_v36 }
 0xa0f   :  { %2213 = vmatprep.subr.bf16.mxu1 %v3054_v37  ;;  %2254 = vmatprep.subr.bf16.mxu0 %v3057_v38 }
 0xa10   :  { %2243 = vmatprep.mubr.bf16.mxu1 %v3234_v0  ;;  %2284 = vmatprep.mubr.bf16.mxu0 %v3234_v0  ;;  %v3073_v0 = vld [vmem:[#allocation2 + $0x148] ss:$48 sps:$4 sm:$0xff]  }
 0xa12   :  { %2214 = vmatpush1.bf16.msra.mxu1 %v3052_v40  ;;  %2255 = vmatpush1.bf16.msra.mxu0 %v3055_v41 }
 0xa13   :  { %2215 = vmatprep.subr.bf16.mxu1 %v3060_v42  ;;  %2256 = vmatprep.subr.bf16.mxu0 %v3063_v43 }
 0xa16   :  { %2216 = vmatpush1.bf16.msra.mxu1 %v3058_v44  ;;  %2257 = vmatpush1.bf16.msra.mxu0 %v3061_v45  ;;  %v1898_v45 = vld [vmem:[#allocation10 + $0x16] sm:$0x3f] }
 0xa17   :  { %2217 = vmatprep.subr.bf16.mxu1 %v3066_v22  ;;  %2258 = vmatprep.subr.bf16.mxu0 %v3069_v46  ;;  %v2293_v22 = vld [vmem:[#allocation4] sm:$0xff]  ;;  %v1903_v7 = vrot.slane %v1898_v45, %v3327_v8 }
 0xa18   :  { %v2304_v46 = vrot.slane %v2293_v22, %v3351_v15 }
 0xa1a   :  { %2218 = vmatpush1.bf16.msra.mxu1 %v3064_v47  ;;  %2259 = vmatpush1.bf16.msra.mxu0 %v3067_v48  ;;  %v1907_v47 = vrot.slane %v1898_v45, %v3330_v34 }
 0xa1b   :  { %2219 = vmatprep.subr.bf16.mxu1 %v3072_v49  ;;  %2260 = vmatprep.subr.bf16.mxu0 %v3075_v50  ;;  %v2312_v50 = vcombine.high %v2304_v46, %v2304_v46 }
 0xa1e   :  { %2220 = vmatpush1.bf16.msra.mxu1 %v3070_v51  ;;  %2261 = vmatpush1.bf16.msra.mxu0 %v3073_v0  ;;  %v2297_v51 = vcombine.high %v2293_v22, %v2293_v22 }
 0xa1f   :  { %2221 = vmatprep.subr.bf16.mxu1 %v3078_v52  ;;  %2262 = vmatprep.subr.bf16.mxu0 %v3081_v53  ;;  %v1911_v53 = vrot.slane %v1898_v45, %v3405_v63 }
 0xa22   :  { %2222 = vmatpush1.bf16.msra.mxu1 %v3076_v54  ;;  %2263 = vmatpush1.bf16.msra.mxu0 %v3079_v55  ;;  %v2311_v54 = vrot.slane %v2297_v51, %v3351_v15  ;;  %v1919_v55 = vrot.slane %v1898_v45, %v3417_v27 }
 0xa23   :  { %2223 = vmatprep.subr.bf16.mxu1 %v3084_v56  ;;  %2264 = vmatprep.subr.bf16.mxu0 %v3087_v57 }
 0xa26   :  { %2224 = vmatpush1.bf16.msra.mxu1 %v3082_v59  ;;  %2265 = vmatpush1.bf16.msra.mxu0 %v3085_v60  ;;  %v2660_v59 = vld.sshfl [vmem:[#allocation4 + $0x8] sm:$0x33 pattern:$0x76325410]  ;;  %v1915_v60 = vrot.slane %v1898_v45, %v3408_v1 }
 0xa27   :  { %2225 = vmatprep.subr.bf16.mxu1 %v3090_v61  ;;  %2266 = vmatprep.subr.bf16.mxu0 %v3093_v58  ;;  %v1923_v61 = vrot.slane %v1898_v45, %v3420_v28 }
 0xa2a   :  { %2226 = vmatpush1.bf16.msra.mxu1 %v3088_v62  ;;  %2267 = vmatpush1.bf16.msra.mxu0 %v3091_v39 }
 0xa2d   :  { %2244 = vmatmul.mubr.bf16.vlgmr.msra.gmra.mxu1 %v3373_v24  ;;  %2285 = vmatmul.mubr.bf16.vlgmr.msra.gmra.mxu0 %v3373_v24 }
 0xaad   :  { %v1726_v6 = vpop.f32.mrf.mxu1  ;;  %v1767_v9 = vpop.f32.mrf.mxu0 }
 0xaae   :  { %v1727_v10 = vadd.f32 %v1726_v6, %v1425_v2  ;;  %v1768_v11 = vadd.f32 %v1767_v9, %v1433_v3  ;;  %v2313_v2 = vcombine.high %v2311_v54, %v2311_v54  ;;  %v2321_v3 = vcombine.high %v2660_v59, %v2660_v59 }
 0xaaf   :  { %v1728_v24 = vpop.f32.mrf.mxu1  ;;  %v1769_v12 = vpop.f32.mrf.mxu0 }
 0xab0   :  { %v1729_v13 = vadd.f32 %v1728_v24, %v1429_v4  ;;  %v1770_v14 = vadd.f32 %v1769_v12, %v1437_v5 }
 0xab1   :  { %v1730_v16 = vpop.f32.mrf.mxu1  ;;  %v1771_v17 = vpop.f32.mrf.mxu0 }
 0xab2   :  { %v1821_v18 = vcombine.low %v1727_v10, %v1729_v13  ;;  %v1822_v19 = vcombine.low %v1768_v11, %v1770_v14 }
 0xab3   :  { %v1731_v20 = vpop.f32.mrf.mxu1  ;;  %v1772_v21 = vpop.f32.mrf.mxu0 }
 0xab4   :  { %v1829_v23 = vrot.slane %v1821_v18, %v3351_v15  ;;  %v1836_v25 = vrot.slane %v1822_v19, %v3351_v15 }
 0xab6   :  { %v1837_v26 = vcombine.low %v1829_v23, %v1836_v25 }
 0xab8   :  { %1848 = vst [vmem:[#allocation12 + $0xc] sm:$0xff] %v1837_v26 }
 0xacd   :  { %v1808_v32 = vpop.f32.mrf.mxu1  ;;  %v2204_v33 = vpop.f32.mrf.mxu0 }
 0xace   :  { %v1809_v35 = vadd.f32 %v1808_v32, %v1441_v30  ;;  %v2205_v48 = vadd.f32 %v2204_v33, %v1903_v7 }
 0xacf   :  { %v1810_v36 = vpop.f32.mrf.mxu1  ;;  %v2206_v37 = vpop.f32.mrf.mxu0 }
 0xad0   :  { %v1811_v38 = vadd.f32 %v1810_v36, %v1445_v31  ;;  %v2207_v49 = vadd.f32 %v2206_v37, %v1907_v47  ;;  %v2328_v0 = vadd.f32 %v2304_v46, %v2205_v48 }
 0xad1   :  { %v1812_v40 = vpop.f32.mrf.mxu1  ;;  %v2208_v41 = vpop.f32.mrf.mxu0 }
 0xad2   :  { %v1838_v42 = vcombine.low %v1809_v35, %v1811_v38  ;;  %v2329_v52 = vadd.f32 %v2312_v50, %v2207_v49  ;;  %v2334_v56 = vmul.f32 %v2328_v0, %v2328_v0 }
 0xad3   :  { %v1813_v43 = vpop.f32.mrf.mxu1  ;;  %v2209_v44 = vpop.f32.mrf.mxu0 }
 0xad4   :  { %2611 = vst.sshfl [vmem:[#allocation12 + $0x14] sm:$0x33 pattern:$0x76325410] %v1838_v42  ;;  %v2335_v57 = vmul.f32 %v2329_v52, %v2329_v52  ;;  %v2340_v4 = vsel %vm541_vm13, %v2334_v56, 0.0 }
 0xad5   :  { %v2361_v42 = vld [vmem:[#allocation10 + $0x1c] sm:$0x3f] }
 0xad6   :  { %v2341_v5 = vsel %vm541_vm13, %v2335_v57, 0.0  ;;  %v2374_v43 = vrot.slane %v2361_v42, %v3405_v63  ;;  %v2378_v44 = vrot.slane %v2361_v42, %v3408_v1  ;;  %v2366_v45 = vrot.slane %v2361_v42, %v3327_v8 }
 0xad7   :  { %v2342_v20 = vadd.f32 %v2341_v5, %v2340_v4  ;;  %v2370_v22 = vrot.slane %v2361_v42, %v3330_v34  ;;  %v2382_v46 = vrot.slane %v2361_v42, %v3417_v27  ;;  %v2386_v47 = vrot.slane %v2361_v42, %v3420_v28 }
 0xaed   :  { %v2245_v58 = vpop.f32.mrf.mxu1  ;;  %v2286_v62 = vpop.f32.mrf.mxu0 }
 0xaee   :  { %v2246_v39 = vadd.f32 %v2245_v58, %v1911_v53  ;;  %v2287_v29 = vadd.f32 %v2286_v62, %v1919_v55 }
 0xaef   :  { %v2247_v6 = vpop.f32.mrf.mxu1  ;;  %v2288_v9 = vpop.f32.mrf.mxu0 }
 0xaf0   :  { %v2330_v10 = vadd.f32 %v2311_v54, %v2246_v39  ;;  %v2332_v11 = vadd.f32 %v2660_v59, %v2287_v29  ;;  %v2248_v24 = vadd.f32 %v2247_v6, %v1915_v60  ;;  %v2289_v12 = vadd.f32 %v2288_v9, %v1923_v61 }
 0xaf1   :  { %v2249_v13 = vpop.f32.mrf.mxu1  ;;  %v2290_v14 = vpop.f32.mrf.mxu0 }
 0xaf2   :  { %v2336_v16 = vmul.f32 %v2330_v10, %v2330_v10  ;;  %v2331_v17 = vadd.f32 %v2313_v2, %v2248_v24  ;;  %v2333_v18 = vadd.f32 %v2321_v3, %v2289_v12  ;;  %v2338_v19 = vmul.f32 %v2332_v11, %v2332_v11 }
 0xaf3   :  { %v2250_v21 = vpop.f32.mrf.mxu1  ;;  %v2291_v23 = vpop.f32.mrf.mxu0 }
 0xaf4   :  { %v2343_v25 = vsel %vm541_vm13, %v2336_v16, 0.0  ;;  %v2337_v26 = vmul.f32 %v2331_v17, %v2331_v17  ;;  %v2339_v31 = vmul.f32 %v2333_v18, %v2333_v18  ;;  %v2347_v33 = vsel %vm541_vm13, %v2338_v19, 0.0 }
 0xaf5   :  { %v2344_v30 = vadd.f32 %v2343_v25, %v2342_v20 }
 0xaf6   :  { %v2345_v32 = vsel %vm541_vm13, %v2337_v26, 0.0  ;;  %v2349_v37 = vsel %vm541_vm13, %v2339_v31, 0.0 }
 0xaf7   :  { %v2346_v35 = vadd.f32 %v2345_v32, %v2344_v30 }
 0xaf9   :  { %v2348_v36 = vadd.f32 %v2347_v33, %v2346_v35 }
 0xafb   :  { %v2350_v38 = vadd.f32 %v2349_v37, %v2348_v36 }
 0xafd   :  { %2351 = vadd.xlane.f32.xlu0 %v2350_v38 }
 0xb86   :  { %v2352_v40 = vpop.xlane.xlu0 %2351 }
 0xb87   :  { %v2353_v41 = vmax.f32 %v2352_v40, 1e-24 }
 0xb89   :  { %3094 = vrsqrt.f32 %v2353_v41 }
 0xb96   :  { %v3095_v7 = vpop.eup %3094 }
 0xb97   :  { %v2355_v48 = vmul.f32 %v3095_v7, %v2328_v0  ;;  %v2356_v49 = vmul.f32 %v3095_v7, %v2329_v52  ;;  %v2357_v50 = vmul.f32 %v3095_v7, %v2330_v10  ;;  %v2358_v51 = vmul.f32 %v3095_v7, %v2331_v17 }
 0xb98   :  { %v2359_v53 = vmul.f32 %v3095_v7, %v2332_v11  ;;  %v2360_v54 = vmul.f32 %v3095_v7, %v2333_v18 }
 0xb99   :  { %v2393_v55 = vmul.f32 %v2366_v45, %v2355_v48  ;;  %v2394_v56 = vmul.f32 %v2370_v22, %v2356_v49  ;;  %v2395_v63 = vmul.f32 %v2374_v43, %v2357_v50  ;;  %v2396_v57 = vmul.f32 %v2378_v44, %v2358_v51 }
 0xb9a   :  { %v2397_v1 = vmul.f32 %v2382_v46, %v2359_v53  ;;  %v2398_v59 = vmul.f32 %v2386_v47, %v2360_v54 }
 0xb9b   :  { %v2405_v8 = vcombine.low %v2393_v55, %v2394_v56  ;;  %v2406_v60 = vcombine.low %v2395_v63, %v2396_v57 }
 0xb9c   :  { %v2422_v34 = vcombine.low %v2397_v1, %v2398_v59 }
 0xb9d   :  { %v2413_v27 = vrot.slane %v2405_v8, %v3351_v15  ;;  %v2420_v28 = vrot.slane %v2406_v60, %v3351_v15 }
 0xb9e   :  { %2661 = vst.sshfl [vmem:[#allocation12 + $0x8] sm:$0x33 pattern:$0x76325410] %v2422_v34 }
 0xb9f   :  { %v2421_v0 = vcombine.low %v2413_v27, %v2420_v28 }
 0xba1   :  { %2432 = vst [vmem:[#allocation12] sm:$0xff] %v2421_v0 }
 0xba2   :  { %3207 = shalt.err (!%p3204_p1)
}
 0xba3   :  { %2443 = dma.vmem_to_hbm [thread:$0]  %s2441_s28, 384, %s3456_s7, [#allocation6]  }
 0xba4   :  { %3224 = dma.done.wait [#allocation6], 384  }
 0xba5   :  { %3225 = vsyncadd [#allocation6], 4294966912 }
 0xba6   :  { %2447 = vsyncpa [#allocation5], 1 }
 0xba7   :  { %2448 = vsyncpa [#allocation8], 1 }
 0xba8   :  { %2449 = vsyncpa [#allocation11], 1 }
 0xba9   :  { %2450 = vsyncpa [#allocation6], 1 }
 0xbaa   :  { %2451 = vsyncmov [#allocation3] }
 0xbad   :  { %s2452_s9 = vpop.sfrf %2451 }
 0xbae   :  { %p2662_p2 = scmp.ne.s32.totalorder %s2452_s9, 0 }
 0xbb0   :  { %2456 = shalt.err (%p2662_p2)  }

</bundles_post_ra>
